<compile_context>
chip_gen: v6e
topology: v6e:2x2x1
jax: 0.10.0
libtpu: 0.0.40
codegen_flags: <defaults>
</compile_context>

<pallas_src>
import math

import numpy as np
import jax
import jax.numpy as jnp
from jax.experimental import pallas as pl
from jax.experimental.pallas import tpu as pltpu  # noqa: F401  (TPU backend)

# ----------------------------- configuration --------------------------------
B = 2                 # batch
T = 16                # encoder memory length
N_MELS = 8            # n_mels
MEMORY_DIM = 32       # memory_dim
PRENET_SIZES = (32, 16)
P1, P2 = PRENET_SIZES
ATTN_RNN = 32         # attn_rnn_size
ATTN_DIM = 16         # attn_dim
STATIC_CH = 8
STATIC_K = 5          # static_kernel_size (odd)
DYN_CH = 8
DYN_K = 5             # dynamic_kernel_size (odd)
PRIOR_LEN = 5
ALPHA = 0.1
BETA = 0.9
DEC_RNN = 32          # decoder_rnn_size
RED = 2               # reduction_factor

# ---- packed recurrent-state input slab (B, S_TOTAL), lane offsets ----
S_Y = 0
S_CTX = S_Y + N_MELS
S_AH = S_CTX + MEMORY_DIM
S_AC = S_AH + ATTN_RNN
S_H1 = S_AC + ATTN_RNN
S_C1 = S_H1 + DEC_RNN
S_H2 = S_C1 + DEC_RNN
S_C2 = S_H2 + DEC_RNN
S_AW = S_C2 + DEC_RNN
S_TOTAL = S_AW + T                  # 248

# ---- packed output slab (B, O_TOTAL) -- one lane-dense (B, 256) store ----
O_Y = 0
O_CTX = O_Y + N_MELS * RED
O_AH = O_CTX + MEMORY_DIM
O_AC = O_AH + ATTN_RNN
O_H1 = O_AC + ATTN_RNN
O_C1 = O_H1 + DEC_RNN
O_H2 = O_C1 + DEC_RNN
O_C2 = O_H2 + DEC_RNN
O_AW = O_C2 + DEC_RNN
O_TOTAL = O_AW + T                  # 256

# ---- compact weight slab: (80, 576) f32, ~184 KB (was 80x1408, ~450 KB) ----
AR_IN = MEMORY_DIM + P2 + ATTN_RNN  # 80 rows of the fused attention-LSTM weight
W_ROWS = AR_IN

C_AR = 0                            # attention LSTM  [W_ih; W_hh]^T   (80, 128)
C_R1 = C_AR + 4 * ATTN_RNN          # decoder LSTM1   [W_ih; W_hh]^T   (64, 128)
C_R2 = C_R1 + 4 * DEC_RNN           # decoder LSTM2   [W_ih; W_hh]^T   (64, 128)
C_DP = C_R2 + 4 * DEC_RNN           # decoder projection  W^T          (64, 32)
C_PW1 = C_DP + DEC_RNN              # prenet fc1  W^T                  (8, 32)
C_PW2 = C_PW1 + P1                  # prenet fc2  W^T                  (32, 16)
C_WQ = C_PW2 + P2                   # DCA query proj  W^T              (32, 16)
C_OUT = C_WQ + ATTN_DIM             # output projection  W^T           (32, 16)
C_VT = C_OUT + N_MELS * RED         # DCA V folded with T              (16, 80)
W_COLS = C_VT + DYN_K * ATTN_DIM    # 576

# blocks packed into the otherwise-unused rows below the decoder-LSTM weights
R_BIAS0 = 2 * DEC_RNN               # bias rows live at rows 64..72 of the R1 chunk
C_BIAS = C_R1
R_PRIOR = 2 * DEC_RNN               # prior Toeplitz (T, T) at rows 64..80 of the R2 chunk
C_PRIOR = C_R2
R_UF = 2 * DEC_RNN                  # folded U*F rows (STATIC_K, ATTN_DIM)
C_UF = C_R2 + T

# bias rows inside the bias block
R_PRE1, R_PRE2, R_AR, R_Q, R_TB, R_VW, R_DP, R_R1, R_R2 = range(9)


# ----------------------------- host-side helpers ----------------------------
def _betabinom_pmf(k, n, a, b):
    lg = math.lgamma
    return math.exp(lg(n + 1) - lg(k + 1) - lg(n - k + 1)
                    + lg(k + a) + lg(n - k + b) - lg(n + a + b)
                    + lg(a + b) - lg(a) - lg(b))


def build_prior_matrix(seq_len, prior_len, alpha, beta):
    """P[j, t] = pmf[t - j] so that (aw @ P)[b, t] = sum_d pmf[d] * aw[b, t - d]."""
    pmf = np.array([_betabinom_pmf(k, prior_len - 1, alpha, beta)
                    for k in range(prior_len)], dtype=np.float32)
    m = np.zeros((seq_len, seq_len), np.float32)
    for j in range(seq_len):
        for t in range(seq_len):
            d = t - j
            if 0 <= d < prior_len:
                m[j, t] = pmf[d]
    return m


# ------------------------------- the kernel ---------------------------------
def decoder_step_kernel(state_ref, mem_ref, w_ref, out_ref):
    f32 = jnp.float32
    dot = lambda a, b: jnp.dot(a, b, preferred_element_type=f32)
    sig = jax.nn.sigmoid

    def wblk(r, nr, c, nc):                 # weight block (arbitrary static offsets)
        return w_ref[r:r + nr, c:c + nc]

    def bias(row, width):                   # one bias per row of the bias block
        return w_ref[R_BIAS0 + row:R_BIAS0 + row + 1, C_BIAS:C_BIAS + width]

    def lstm(x_cat, c_prev, w_all, b_row, hdim):
        g = dot(x_cat, w_all) + b_row       # single fused gate matmul
        i = sig(g[:, 0 * hdim:1 * hdim])
        f = sig(g[:, 1 * hdim:2 * hdim])
        cc = jnp.tanh(g[:, 2 * hdim:3 * hdim])
        o = sig(g[:, 3 * hdim:4 * hdim])
        c_new = f * c_prev + i * cc
        return o * jnp.tanh(c_new), c_new

    # ---------------- unpack recurrent state (one lane-dense load) ----------
    st = state_ref[...]                                   # (B, S_TOTAL)
    y = st[:, S_Y:S_Y + N_MELS]
    ctx = st[:, S_CTX:S_CTX + MEMORY_DIM]
    ah = st[:, S_AH:S_AH + ATTN_RNN]
    ac = st[:, S_AC:S_AC + ATTN_RNN]
    h1 = st[:, S_H1:S_H1 + DEC_RNN]
    c1 = st[:, S_C1:S_C1 + DEC_RNN]
    h2 = st[:, S_H2:S_H2 + DEC_RNN]
    c2 = st[:, S_C2:S_C2 + DEC_RNN]
    aw = st[:, S_AW:S_AW + T]                             # (B, T) prev attention weights

    # ---------------- PreNet ----------------
    # TODO(synk): reference PreNet applies dropout with training=True even in eval;
    # omitted here so the kernel is deterministic.
    hp = jnp.maximum(dot(y, wblk(0, N_MELS, C_PW1, P1)) + bias(R_PRE1, P1), 0.0)
    hp = jnp.maximum(dot(hp, wblk(0, P1, C_PW2, P2)) + bias(R_PRE2, P2), 0.0)

    # ---------------- attention LSTM (single fused gate matmul) ----------------
    x_ar = jnp.concatenate([ctx, hp, ah], axis=1)          # (B, 80)
    ah_new, ac_new = lstm(x_ar, ac, wblk(0, AR_IN, C_AR, 4 * ATTN_RNN),
                          bias(R_AR, 4 * ATTN_RNN), ATTN_RNN)
    # zoneout: no-op at inference

    # ---------------- Dynamic Convolution Attention ----------------
    # prior convolution: one lane-dense (B,T)@(T,T) MXU matmul
    prior = dot(aw, wblk(R_PRIOR, T, C_PRIOR, T))          # (B, T)
    logp = jnp.log(jnp.maximum(prior, 1e-6))

    # all DYN_K dynamic filters (pre-folded with the T projection) in one matmul
    q = jnp.tanh(dot(ah_new, wblk(0, ATTN_RNN, C_WQ, ATTN_DIM)) + bias(R_Q, ATTN_DIM))
    hdyn = dot(q, wblk(0, ATTN_DIM, C_VT, DYN_K * ATTN_DIM))      # (B, DYN_K*ATTN_DIM)

    # 'same'-padded shift taps = lane slices of a zero-padded copy of aw
    pad_s = (STATIC_K - 1) // 2
    pad_d = (DYN_K - 1) // 2
    zs = jnp.zeros((B, pad_s), f32)
    zd = jnp.zeros((B, pad_d), f32)
    aw_ps = jnp.concatenate([zs, aw, zs], axis=1)          # (B, T + STATIC_K - 1)
    aw_pd = jnp.concatenate([zd, aw, zd], axis=1)          # (B, T + DYN_K - 1)

    # batch-vectorized feature accumulation on (B, T, ATTN_DIM) tiles
    feat = bias(R_TB, ATTN_DIM)[None]                      # (1, 1, A) broadcast bias
    for k in range(STATIC_K):
        feat = feat + aw_ps[:, k:k + T, None] * wblk(R_UF + k, 1, C_UF, ATTN_DIM)[None]
    for k in range(DYN_K):
        feat = feat + (aw_pd[:, k:k + T, None]
                       * hdyn[:, None, k * ATTN_DIM:(k + 1) * ATTN_DIM])

    e = jnp.sum(jnp.tanh(feat) * bias(R_VW, ATTN_DIM)[None], axis=-1) + logp   # (B, T)

    # batch-vectorized softmax with an EXACT reciprocal (feeds the AR recurrence)
    e = e - jnp.max(e, axis=-1, keepdims=True)
    p = jnp.exp(e)
    aw_new = p / jnp.sum(p, axis=-1, keepdims=True)        # (B, T)

    # context: per-batch (1,T)@(T,D) MXU matmuls (B == 2, unrolled)
    ctx_new = jnp.concatenate(
        [dot(aw_new[b:b + 1, :], mem_ref[b]) for b in range(B)], axis=0)   # (B, D)

    # ---------------- decoder projection (fused) ----------------
    dinp = dot(jnp.concatenate([ctx_new, ah_new], axis=1),
               wblk(0, MEMORY_DIM + ATTN_RNN, C_DP, DEC_RNN)) + bias(R_DP, DEC_RNN)

    # ---------------- decoder LSTM 1 + residual ----------------
    h1_new, c1_new = lstm(jnp.concatenate([dinp, h1], axis=1), c1,
                          wblk(0, 2 * DEC_RNN, C_R1, 4 * DEC_RNN),
                          bias(R_R1, 4 * DEC_RNN), DEC_RNN)
    dinp = dinp + h1_new

    # ---------------- decoder LSTM 2 + residual ----------------
    h2_new, c2_new = lstm(jnp.concatenate([dinp, h2], axis=1), c2,
                          wblk(0, 2 * DEC_RNN, C_R2, 4 * DEC_RNN),
                          bias(R_R2, 4 * DEC_RNN), DEC_RNN)
    dinp = dinp + h2_new

    # ---------------- output projection (no bias) ----------------
    y_new = dot(dinp, wblk(0, DEC_RNN, C_OUT, N_MELS * RED))          # (B, N_MELS*RED)

    # single lane-dense (B, 256) packed write of every batch-major output
    out_ref[...] = jnp.concatenate(
        [y_new, ctx_new, ah_new, ac_new, h1_new, c1_new, h2_new, c2_new, aw_new],
        axis=1)


# ------------------------------- wrapper -------------------------------------
def decoder_step(y, memory, attn_w, attn_ctx, attn_hx, d1_hx, d2_hx, slab_w):
    state = jnp.concatenate(
        [y, attn_ctx, attn_hx[0], attn_hx[1],
         d1_hx[0], d1_hx[1], d2_hx[0], d2_hx[1], attn_w], axis=1)     # (B, S_TOTAL)

    out = pl.pallas_call(
        decoder_step_kernel,
        out_shape=jax.ShapeDtypeStruct((B, O_TOTAL), jnp.float32),
    )(state, memory, slab_w)

    y_out = out[:, O_Y:O_Y + N_MELS * RED].reshape(B, N_MELS, RED)
    ctx_new = out[:, O_CTX:O_CTX + MEMORY_DIM]
    ah = out[:, O_AH:O_AH + ATTN_RNN]
    ac = out[:, O_AC:O_AC + ATTN_RNN]
    h1 = out[:, O_H1:O_H1 + DEC_RNN]
    c1 = out[:, O_C1:O_C1 + DEC_RNN]
    h2 = out[:, O_H2:O_H2 + DEC_RNN]
    c2 = out[:, O_C2:O_C2 + DEC_RNN]
    aw_new = out[:, O_AW:O_AW + T]
    return y_out, aw_new, ctx_new, (ah, ac), (h1, c1), (h2, c2)


decoder_step = jax.jit(decoder_step)


# ------------------------------ parameters -----------------------------------
def init_params(key):
    keys = iter(jax.random.split(key, 32))

    def rnd(*shape):
        return 0.1 * jax.random.normal(next(keys), shape, dtype=jnp.float32)

    # raw params in PyTorch (out_features, in_features) convention
    return dict(
        pre_w1=rnd(P1, N_MELS), pre_b1=rnd(P1),
        pre_w2=rnd(P2, P1), pre_b2=rnd(P2),
        ar_wih=rnd(4 * ATTN_RNN, MEMORY_DIM + P2), ar_whh=rnd(4 * ATTN_RNN, ATTN_RNN),
        ar_b=rnd(4 * ATTN_RNN),                        # b_ih + b_hh combined
        w_q=rnd(ATTN_DIM, ATTN_RNN), b_q=rnd(ATTN_DIM),
        v_w=rnd(DYN_CH * DYN_K, ATTN_DIM),             # V  (no bias)
        f_w=rnd(STATIC_CH, STATIC_K),                  # F  conv1d weight (C,1,K) squeezed
        u_w=rnd(ATTN_DIM, STATIC_CH),                  # U  (no bias)
        t_w=rnd(ATTN_DIM, DYN_CH), t_b=rnd(ATTN_DIM),  # T
        v_proj=rnd(1, ATTN_DIM),                       # v  (no bias)
        dp_w=rnd(DEC_RNN, MEMORY_DIM + ATTN_RNN), dp_b=rnd(DEC_RNN),
        r1_wih=rnd(4 * DEC_RNN, DEC_RNN), r1_whh=rnd(4 * DEC_RNN, DEC_RNN), r1_b=rnd(4 * DEC_RNN),
        r2_wih=rnd(4 * DEC_RNN, DEC_RNN), r2_whh=rnd(4 * DEC_RNN, DEC_RNN), r2_b=rnd(4 * DEC_RNN),
        out_w=rnd(N_MELS * RED, DEC_RNN),              # no bias
    )


def pack_params(raw):
    """Fold/transpose raw params into kernel layout and pack into ONE compact slab."""
    f32 = np.float32
    A = lambda x: np.asarray(x, f32)

    # fold DCA weights
    vmat = A(raw['v_w']).reshape(DYN_CH, DYN_K, ATTN_DIM)          # V reshaped (C, K, A_in)
    vt = np.einsum('cka,dc->kad', vmat, A(raw['t_w']))             # (K, A_in, A_out)
    vt_flat = np.transpose(vt, (1, 0, 2)).reshape(ATTN_DIM, DYN_K * ATTN_DIM)
    uf = np.einsum('ac,ck->ka', A(raw['u_w']), A(raw['f_w']))      # (K_stat, A)

    slab = np.zeros((W_ROWS, W_COLS), f32)

    def put(r, c, x):
        x = A(x)
        slab[r:r + x.shape[0], c:c + x.shape[1]] = x

    put(0, C_AR, np.concatenate([A(raw['ar_wih']).T, A(raw['ar_whh']).T], axis=0))
    put(0, C_R1, np.concatenate([A(raw['r1_wih']).T, A(raw['r1_whh']).T], axis=0))
    put(0, C_R2, np.concatenate([A(raw['r2_wih']).T, A(raw['r2_whh']).T], axis=0))
    put(0, C_DP, A(raw['dp_w']).T)
    put(0, C_PW1, A(raw['pre_w1']).T)
    put(0, C_PW2, A(raw['pre_w2']).T)
    put(0, C_WQ, A(raw['w_q']).T)
    put(0, C_OUT, A(raw['out_w']).T)
    put(0, C_VT, vt_flat)
    # packed into the free rows below the decoder-LSTM weight blocks
    put(R_PRIOR, C_PRIOR, build_prior_matrix(T, PRIOR_LEN, ALPHA, BETA))
    put(R_UF, C_UF, uf)
    # biases: one per row of the bias block
    put(R_BIAS0 + R_PRE1, C_BIAS, A(raw['pre_b1'])[None, :])
    put(R_BIAS0 + R_PRE2, C_BIAS, A(raw['pre_b2'])[None, :])
    put(R_BIAS0 + R_AR, C_BIAS, A(raw['ar_b'])[None, :])
    put(R_BIAS0 + R_Q, C_BIAS, A(raw['b_q'])[None, :])
    put(R_BIAS0 + R_TB, C_BIAS, A(raw['t_b'])[None, :])
    put(R_BIAS0 + R_VW, C_BIAS, A(raw['v_proj']))
    put(R_BIAS0 + R_DP, C_BIAS, A(raw['dp_b'])[None, :])
    put(R_BIAS0 + R_R1, C_BIAS, A(raw['r1_b'])[None, :])
    put(R_BIAS0 + R_R2, C_BIAS, A(raw['r2_b'])[None, :])

    return jnp.asarray(slab)


# --------------------------- pure-JAX reference -------------------------------
def reference_step(y, memory, attn_w, attn_ctx, attn_hx, d1_hx, d2_hx, raw):
    relu, sig = jax.nn.relu, jax.nn.sigmoid

    def lstm_cell(x, hx, wih, whh, bb):
        h_prev, c_prev = hx
        g = x @ wih.T + h_prev @ whh.T + bb
        H = whh.shape[1]
        i, f, gg, o = (sig(g[:, :H]), sig(g[:, H:2 * H]),
                       jnp.tanh(g[:, 2 * H:3 * H]), sig(g[:, 3 * H:]))
        c = f * c_prev + i * gg
        return o * jnp.tanh(c), c

    hp = relu(y @ raw['pre_w1'].T + raw['pre_b1'])
    hp = relu(hp @ raw['pre_w2'].T + raw['pre_b2'])
    ah, ac = lstm_cell(jnp.concatenate([attn_ctx, hp], axis=1), attn_hx,
                       raw['ar_wih'], raw['ar_whh'], raw['ar_b'])

    aw = attn_w
    pad_s, pad_d = (STATIC_K - 1) // 2, (DYN_K - 1) // 2
    aw_ps = jnp.pad(aw, ((0, 0), (pad_s, pad_s)))
    aw_pd = jnp.pad(aw, ((0, 0), (pad_d, pad_d)))
    sh_s = jnp.stack([aw_ps[:, k:k + T] for k in range(STATIC_K)], axis=-1)
    sh_d = jnp.stack([aw_pd[:, k:k + T] for k in range(DYN_K)], axis=-1)
    uf_feat = jnp.einsum('btc,ac->bta', jnp.einsum('btk,ck->btc', sh_s, raw['f_w']), raw['u_w'])
    q = jnp.tanh(ah @ raw['w_q'].T + raw['b_q'])
    G = (q @ raw['v_w'].T).reshape(B, DYN_CH, DYN_K)
    tg_feat = jnp.einsum('btc,ac->bta', jnp.einsum('btk,bck->btc', sh_d, G),
                         raw['t_w']) + raw['t_b']
    pmf = jnp.asarray([_betabinom_pmf(k, PRIOR_LEN - 1, ALPHA, BETA)
                       for k in range(PRIOR_LEN)], dtype=jnp.float32)
    aw_pp = jnp.pad(aw, ((0, 0), (PRIOR_LEN - 1, 0)))
    prior_taps = jnp.stack([aw_pp[:, PRIOR_LEN - 1 - d:PRIOR_LEN - 1 - d + T]
                            for d in range(PRIOR_LEN)], axis=-1)
    logp = jnp.log(jnp.maximum(jnp.einsum('btd,d->bt', prior_taps, pmf), 1e-6))
    e = jnp.einsum('bta,a->bt', jnp.tanh(uf_feat + tg_feat), raw['v_proj'][0]) + logp
    aw_new = jax.nn.softmax(e, axis=-1)
    ctx = jnp.einsum('bt,btd->bd', aw_new, memory)

    dinp = jnp.concatenate([ctx, ah], axis=1) @ raw['dp_w'].T + raw['dp_b']
    h1, c1 = lstm_cell(dinp, d1_hx, raw['r1_wih'], raw['r1_whh'], raw['r1_b'])
    dinp = dinp + h1
    h2, c2 = lstm_cell(dinp, d2_hx, raw['r2_wih'], raw['r2_whh'], raw['r2_b'])
    dinp = dinp + h2
    y_out = (dinp @ raw['out_w'].T).reshape(B, N_MELS, RED)
    return y_out, aw_new, ctx, (ah, ac), (h1, c1), (h2, c2)


# --------------------------------- main ---------------------------------------
if __name__ == "__main__":
    key = jax.random.PRNGKey(0)
    pkey, dkey = jax.random.split(key)
    raw = init_params(pkey)
    slab_w = pack_params(raw)

    dks = jax.random.split(dkey, 10)
    y = jax.random.normal(dks[0], (B, N_MELS), jnp.float32)
    memory = jax.random.normal(dks[1], (B, T, MEMORY_DIM), jnp.float32)
    attn_w = jax.nn.softmax(jax.random.normal(dks[2], (B, T), jnp.float32), axis=-1)
    attn_ctx = jax.random.normal(dks[3], (B, MEMORY_DIM), jnp.float32)
    attn_hx = (0.1 * jax.random.normal(dks[4], (B, ATTN_RNN), jnp.float32),
               0.1 * jax.random.normal(dks[5], (B, ATTN_RNN), jnp.float32))
    d1_hx = (0.1 * jax.random.normal(dks[6], (B, DEC_RNN), jnp.float32),
             0.1 * jax.random.normal(dks[7], (B, DEC_RNN), jnp.float32))
    d2_hx = (0.1 * jax.random.normal(dks[8], (B, DEC_RNN), jnp.float32),
             0.1 * jax.random.normal(dks[9], (B, DEC_RNN), jnp.float32))

    outs = decoder_step(y, memory, attn_w, attn_ctx, attn_hx, d1_hx, d2_hx, slab_w)
    outs = jax.block_until_ready(outs)

    y_out, aw_out, ctx_out, (ah, ac), (h1, c1), (h2, c2) = outs
    assert y_out.shape == (B, N_MELS, RED)
    assert aw_out.shape == (B, T)
    assert ctx_out.shape == (B, MEMORY_DIM)
    assert ah.shape == ac.shape == (B, ATTN_RNN)
    assert h1.shape == c1.shape == h2.shape == c2.shape == (B, DEC_RNN)

    # check the fused/packed kernel against a pure-JAX reference of the same step
    ref = reference_step(y, memory, attn_w, attn_ctx, attn_hx, d1_hx, d2_hx, raw)
    for got, want in zip(jax.tree_util.tree_leaves(outs), jax.tree_util.tree_leaves(ref)):
        np.testing.assert_allclose(np.asarray(got), np.asarray(want), rtol=1e-2, atol=1e-3)

    print("KERNEL_OK")
</pallas_src>

<mosaic_0001>
module attributes {stable_mosaic.version = 11 : i64} {
  func.func @decoder_step_kernel(%arg0: memref<2x248xf32, #tpu.memory_space<vmem>>, %arg1: memref<2x16x32xf32, #tpu.memory_space<vmem>>, %arg2: memref<80x576xf32, #tpu.memory_space<vmem>>, %arg3: memref<2x256xf32, #tpu.memory_space<vmem>>) attributes {dimension_semantics = [], scalar_prefetch = 0 : i64, scratch_operands = 0 : i64, tpu.core_type = #tpu.core_type<tc>} {
    %c0 = arith.constant 0 : index
    %c0_0 = arith.constant 0 : index
    %0 = vector.load %arg0[%c0, %c0_0] : memref<2x248xf32, #tpu.memory_space<vmem>>, vector<2x248xf32>
    %1 = vector.extract_strided_slice %0 {offsets = [0, 0], sizes = [2, 8], strides = [1, 1]} : vector<2x248xf32> to vector<2x8xf32>
    %2 = vector.extract_strided_slice %0 {offsets = [0, 8], sizes = [2, 32], strides = [1, 1]} : vector<2x248xf32> to vector<2x32xf32>
    %3 = vector.extract_strided_slice %0 {offsets = [0, 40], sizes = [2, 32], strides = [1, 1]} : vector<2x248xf32> to vector<2x32xf32>
    %4 = vector.extract_strided_slice %0 {offsets = [0, 72], sizes = [2, 32], strides = [1, 1]} : vector<2x248xf32> to vector<2x32xf32>
    %5 = vector.extract_strided_slice %0 {offsets = [0, 104], sizes = [2, 32], strides = [1, 1]} : vector<2x248xf32> to vector<2x32xf32>
    %6 = vector.extract_strided_slice %0 {offsets = [0, 136], sizes = [2, 32], strides = [1, 1]} : vector<2x248xf32> to vector<2x32xf32>
    %7 = vector.extract_strided_slice %0 {offsets = [0, 168], sizes = [2, 32], strides = [1, 1]} : vector<2x248xf32> to vector<2x32xf32>
    %8 = vector.extract_strided_slice %0 {offsets = [0, 200], sizes = [2, 32], strides = [1, 1]} : vector<2x248xf32> to vector<2x32xf32>
    %9 = vector.extract_strided_slice %0 {offsets = [0, 232], sizes = [2, 16], strides = [1, 1]} : vector<2x248xf32> to vector<2x16xf32>
    %c0_1 = arith.constant 0 : index
    %c416 = arith.constant 416 : index
    %10 = vector.load %arg2[%c0_1, %c416] : memref<80x576xf32, #tpu.memory_space<vmem>>, vector<8x32xf32>
    %cst = arith.constant dense<0.000000e+00> : vector<2x32xf32>
    %11 = tpu.matmul %1, %10, %cst {dimension_numbers = #tpu.dot_dimension_numbers<[1], [0], [0], [1], [0, 0, 1, 1], [], []>} : vector<2x8xf32>, vector<8x32xf32>, vector<2x32xf32> -> vector<2x32xf32>
    %c64 = arith.constant 64 : index
    %c128 = arith.constant 128 : index
    %12 = vector.load %arg2[%c64, %c128] : memref<80x576xf32, #tpu.memory_space<vmem>>, vector<1x32xf32>
    %13 = vector.broadcast %12 : vector<1x32xf32> to vector<2x32xf32>
    %14 = arith.addf %11, %13 : vector<2x32xf32>
    %cst_2 = arith.constant 0.000000e+00 : f32
    %15 = vector.broadcast %cst_2 : f32 to vector<2x32xf32>
    %16 = arith.maximumf %14, %15 : vector<2x32xf32>
    %c0_3 = arith.constant 0 : index
    %c448 = arith.constant 448 : index
    %17 = vector.load %arg2[%c0_3, %c448] : memref<80x576xf32, #tpu.memory_space<vmem>>, vector<32x16xf32>
    %cst_4 = arith.constant dense<0.000000e+00> : vector<2x16xf32>
    %18 = tpu.matmul %16, %17, %cst_4 {dimension_numbers = #tpu.dot_dimension_numbers<[1], [0], [0], [1], [0, 0, 1, 1], [], []>} : vector<2x32xf32>, vector<32x16xf32>, vector<2x16xf32> -> vector<2x16xf32>
    %c65 = arith.constant 65 : index
    %c128_5 = arith.constant 128 : index
    %19 = vector.load %arg2[%c65, %c128_5] : memref<80x576xf32, #tpu.memory_space<vmem>>, vector<1x16xf32>
    %20 = vector.broadcast %19 : vector<1x16xf32> to vector<2x16xf32>
    %21 = arith.addf %18, %20 : vector<2x16xf32>
    %cst_6 = arith.constant 0.000000e+00 : f32
    %22 = vector.broadcast %cst_6 : f32 to vector<2x16xf32>
    %23 = arith.maximumf %21, %22 : vector<2x16xf32>
    %24 = tpu.concatenate %2, %23, %3 in 1 : vector<2x32xf32>, vector<2x16xf32>, vector<2x32xf32> -> vector<2x80xf32>
    %c0_7 = arith.constant 0 : index
    %c0_8 = arith.constant 0 : index
    %25 = vector.load %arg2[%c0_7, %c0_8] : memref<80x576xf32, #tpu.memory_space<vmem>>, vector<80x128xf32>
    %c66 = arith.constant 66 : index
    %c128_9 = arith.constant 128 : index
    %26 = vector.load %arg2[%c66, %c128_9] : memref<80x576xf32, #tpu.memory_space<vmem>>, vector<1x128xf32>
    %cst_10 = arith.constant dense<0.000000e+00> : vector<2x128xf32>
    %27 = tpu.matmul %24, %25, %cst_10 {dimension_numbers = #tpu.dot_dimension_numbers<[1], [0], [0], [1], [0, 0, 1, 1], [], []>} : vector<2x80xf32>, vector<80x128xf32>, vector<2x128xf32> -> vector<2x128xf32>
    %28 = vector.broadcast %26 : vector<1x128xf32> to vector<2x128xf32>
    %29 = arith.addf %27, %28 : vector<2x128xf32>
    %30 = vector.extract_strided_slice %29 {offsets = [0, 0], sizes = [2, 32], strides = [1, 1]} : vector<2x128xf32> to vector<2x32xf32>
    %31 = arith.negf %30 : vector<2x32xf32>
    %32 = math.exp %31 : vector<2x32xf32>
    %cst_11 = arith.constant 1.000000e+00 : f32
    %33 = vector.broadcast %cst_11 : f32 to vector<2x32xf32>
    %34 = arith.addf %33, %32 : vector<2x32xf32>
    %35 = arith.divf %33, %34 : vector<2x32xf32>
    %36 = vector.extract_strided_slice %29 {offsets = [0, 32], sizes = [2, 32], strides = [1, 1]} : vector<2x128xf32> to vector<2x32xf32>
    %37 = arith.negf %36 : vector<2x32xf32>
    %38 = math.exp %37 : vector<2x32xf32>
    %cst_12 = arith.constant 1.000000e+00 : f32
    %39 = vector.broadcast %cst_12 : f32 to vector<2x32xf32>
    %40 = arith.addf %39, %38 : vector<2x32xf32>
    %41 = arith.divf %39, %40 : vector<2x32xf32>
    %42 = vector.extract_strided_slice %29 {offsets = [0, 64], sizes = [2, 32], strides = [1, 1]} : vector<2x128xf32> to vector<2x32xf32>
    %43 = math.tanh %42 : vector<2x32xf32>
    %44 = vector.extract_strided_slice %29 {offsets = [0, 96], sizes = [2, 32], strides = [1, 1]} : vector<2x128xf32> to vector<2x32xf32>
    %45 = arith.negf %44 : vector<2x32xf32>
    %46 = math.exp %45 : vector<2x32xf32>
    %cst_13 = arith.constant 1.000000e+00 : f32
    %47 = vector.broadcast %cst_13 : f32 to vector<2x32xf32>
    %48 = arith.addf %47, %46 : vector<2x32xf32>
    %49 = arith.divf %47, %48 : vector<2x32xf32>
    %50 = arith.mulf %41, %4 : vector<2x32xf32>
    %51 = arith.mulf %35, %43 : vector<2x32xf32>
    %52 = arith.addf %50, %51 : vector<2x32xf32>
    %53 = math.tanh %52 : vector<2x32xf32>
    %54 = arith.mulf %49, %53 : vector<2x32xf32>
    %c64_14 = arith.constant 64 : index
    %c256 = arith.constant 256 : index
    %55 = vector.load %arg2[%c64_14, %c256] : memref<80x576xf32, #tpu.memory_space<vmem>>, vector<16x16xf32>
    %cst_15 = arith.constant dense<0.000000e+00> : vector<2x16xf32>
    %56 = tpu.matmul %9, %55, %cst_15 {dimension_numbers = #tpu.dot_dimension_numbers<[1], [0], [0], [1], [0, 0, 1, 1], [], []>} : vector<2x16xf32>, vector<16x16xf32>, vector<2x16xf32> -> vector<2x16xf32>
    %cst_16 = arith.constant 9.99999997E-7 : f32
    %57 = vector.broadcast %cst_16 : f32 to vector<2x16xf32>
    %58 = arith.maximumf %56, %57 : vector<2x16xf32>
    %59 = math.log %58 : vector<2x16xf32>
    %c0_17 = arith.constant 0 : index
    %c464 = arith.constant 464 : index
    %60 = vector.load %arg2[%c0_17, %c464] : memref<80x576xf32, #tpu.memory_space<vmem>>, vector<32x16xf32>
    %cst_18 = arith.constant dense<0.000000e+00> : vector<2x16xf32>
    %61 = tpu.matmul %54, %60, %cst_18 {dimension_numbers = #tpu.dot_dimension_numbers<[1], [0], [0], [1], [0, 0, 1, 1], [], []>} : vector<2x32xf32>, vector<32x16xf32>, vector<2x16xf32> -> vector<2x16xf32>
    %c67 = arith.constant 67 : index
    %c128_19 = arith.constant 128 : index
    %62 = vector.load %arg2[%c67, %c128_19] : memref<80x576xf32, #tpu.memory_space<vmem>>, vector<1x16xf32>
    %63 = vector.broadcast %62 : vector<1x16xf32> to vector<2x16xf32>
    %64 = arith.addf %61, %63 : vector<2x16xf32>
    %65 = math.tanh %64 : vector<2x16xf32>
    %c0_20 = arith.constant 0 : index
    %c496 = arith.constant 496 : index
    %66 = vector.load %arg2[%c0_20, %c496] : memref<80x576xf32, #tpu.memory_space<vmem>>, vector<16x80xf32>
    %cst_21 = arith.constant dense<0.000000e+00> : vector<2x80xf32>
    %67 = tpu.matmul %65, %66, %cst_21 {dimension_numbers = #tpu.dot_dimension_numbers<[1], [0], [0], [1], [0, 0, 1, 1], [], []>} : vector<2x16xf32>, vector<16x80xf32>, vector<2x80xf32> -> vector<2x80xf32>
    %cst_22 = arith.constant 0.000000e+00 : f32
    %68 = vector.broadcast %cst_22 : f32 to vector<2x2xf32>
    %cst_23 = arith.constant 0.000000e+00 : f32
    %69 = vector.broadcast %cst_23 : f32 to vector<2x2xf32>
    %70 = tpu.concatenate %68, %9, %68 in 1 : vector<2x2xf32>, vector<2x16xf32>, vector<2x2xf32> -> vector<2x20xf32>
    %71 = tpu.concatenate %69, %9, %69 in 1 : vector<2x2xf32>, vector<2x16xf32>, vector<2x2xf32> -> vector<2x20xf32>
    %c68 = arith.constant 68 : index
    %c128_24 = arith.constant 128 : index
    %72 = vector.load %arg2[%c68, %c128_24] : memref<80x576xf32, #tpu.memory_space<vmem>>, vector<1x16xf32>
    %73 = vector.shape_cast %72 : vector<1x16xf32> to vector<1x1x16xf32>
    %74 = vector.extract_strided_slice %70 {offsets = [0, 0], sizes = [2, 16], strides = [1, 1]} : vector<2x20xf32> to vector<2x16xf32>
    %75 = vector.shape_cast %74 : vector<2x16xf32> to vector<2x16x1xf32>
    %c64_25 = arith.constant 64 : index
    %c272 = arith.constant 272 : index
    %76 = vector.load %arg2[%c64_25, %c272] : memref<80x576xf32, #tpu.memory_space<vmem>>, vector<1x16xf32>
    %77 = vector.shape_cast %76 : vector<1x16xf32> to vector<1x1x16xf32>
    %78 = vector.broadcast %75 : vector<2x16x1xf32> to vector<2x16x16xf32>
    %79 = vector.broadcast %77 : vector<1x1x16xf32> to vector<2x16x16xf32>
    %80 = arith.mulf %78, %79 : vector<2x16x16xf32>
    %81 = vector.broadcast %73 : vector<1x1x16xf32> to vector<2x16x16xf32>
    %82 = arith.addf %81, %80 : vector<2x16x16xf32>
    %83 = vector.extract_strided_slice %70 {offsets = [0, 1], sizes = [2, 16], strides = [1, 1]} : vector<2x20xf32> to vector<2x16xf32>
    %84 = vector.shape_cast %83 : vector<2x16xf32> to vector<2x16x1xf32>
    %c65_26 = arith.constant 65 : index
    %c272_27 = arith.constant 272 : index
    %85 = vector.load %arg2[%c65_26, %c272_27] : memref<80x576xf32, #tpu.memory_space<vmem>>, vector<1x16xf32>
    %86 = vector.shape_cast %85 : vector<1x16xf32> to vector<1x1x16xf32>
    %87 = vector.broadcast %84 : vector<2x16x1xf32> to vector<2x16x16xf32>
    %88 = vector.broadcast %86 : vector<1x1x16xf32> to vector<2x16x16xf32>
    %89 = arith.mulf %87, %88 : vector<2x16x16xf32>
    %90 = arith.addf %82, %89 : vector<2x16x16xf32>
    %91 = vector.extract_strided_slice %70 {offsets = [0, 2], sizes = [2, 16], strides = [1, 1]} : vector<2x20xf32> to vector<2x16xf32>
    %92 = vector.shape_cast %91 : vector<2x16xf32> to vector<2x16x1xf32>
    %c66_28 = arith.constant 66 : index
    %c272_29 = arith.constant 272 : index
    %93 = vector.load %arg2[%c66_28, %c272_29] : memref<80x576xf32, #tpu.memory_space<vmem>>, vector<1x16xf32>
    %94 = vector.shape_cast %93 : vector<1x16xf32> to vector<1x1x16xf32>
    %95 = vector.broadcast %92 : vector<2x16x1xf32> to vector<2x16x16xf32>
    %96 = vector.broadcast %94 : vector<1x1x16xf32> to vector<2x16x16xf32>
    %97 = arith.mulf %95, %96 : vector<2x16x16xf32>
    %98 = arith.addf %90, %97 : vector<2x16x16xf32>
    %99 = vector.extract_strided_slice %70 {offsets = [0, 3], sizes = [2, 16], strides = [1, 1]} : vector<2x20xf32> to vector<2x16xf32>
    %100 = vector.shape_cast %99 : vector<2x16xf32> to vector<2x16x1xf32>
    %c67_30 = arith.constant 67 : index
    %c272_31 = arith.constant 272 : index
    %101 = vector.load %arg2[%c67_30, %c272_31] : memref<80x576xf32, #tpu.memory_space<vmem>>, vector<1x16xf32>
    %102 = vector.shape_cast %101 : vector<1x16xf32> to vector<1x1x16xf32>
    %103 = vector.broadcast %100 : vector<2x16x1xf32> to vector<2x16x16xf32>
    %104 = vector.broadcast %102 : vector<1x1x16xf32> to vector<2x16x16xf32>
    %105 = arith.mulf %103, %104 : vector<2x16x16xf32>
    %106 = arith.addf %98, %105 : vector<2x16x16xf32>
    %107 = vector.extract_strided_slice %70 {offsets = [0, 4], sizes = [2, 16], strides = [1, 1]} : vector<2x20xf32> to vector<2x16xf32>
    %108 = vector.shape_cast %107 : vector<2x16xf32> to vector<2x16x1xf32>
    %c68_32 = arith.constant 68 : index
    %c272_33 = arith.constant 272 : index
    %109 = vector.load %arg2[%c68_32, %c272_33] : memref<80x576xf32, #tpu.memory_space<vmem>>, vector<1x16xf32>
    %110 = vector.shape_cast %109 : vector<1x16xf32> to vector<1x1x16xf32>
    %111 = vector.broadcast %108 : vector<2x16x1xf32> to vector<2x16x16xf32>
    %112 = vector.broadcast %110 : vector<1x1x16xf32> to vector<2x16x16xf32>
    %113 = arith.mulf %111, %112 : vector<2x16x16xf32>
    %114 = arith.addf %106, %113 : vector<2x16x16xf32>
    %115 = vector.extract_strided_slice %71 {offsets = [0, 0], sizes = [2, 16], strides = [1, 1]} : vector<2x20xf32> to vector<2x16xf32>
    %116 = vector.shape_cast %115 : vector<2x16xf32> to vector<2x16x1xf32>
    %117 = vector.extract_strided_slice %67 {offsets = [0, 0], sizes = [2, 16], strides = [1, 1]} : vector<2x80xf32> to vector<2x16xf32>
    %118 = vector.shape_cast %117 : vector<2x16xf32> to vector<2x1x16xf32>
    %119 = vector.broadcast %116 : vector<2x16x1xf32> to vector<2x16x16xf32>
    %120 = vector.broadcast %118 : vector<2x1x16xf32> to vector<2x16x16xf32>
    %121 = arith.mulf %119, %120 : vector<2x16x16xf32>
    %122 = arith.addf %114, %121 : vector<2x16x16xf32>
    %123 = vector.extract_strided_slice %71 {offsets = [0, 1], sizes = [2, 16], strides = [1, 1]} : vector<2x20xf32> to vector<2x16xf32>
    %124 = vector.shape_cast %123 : vector<2x16xf32> to vector<2x16x1xf32>
    %125 = vector.extract_strided_slice %67 {offsets = [0, 16], sizes = [2, 16], strides = [1, 1]} : vector<2x80xf32> to vector<2x16xf32>
    %126 = vector.shape_cast %125 : vector<2x16xf32> to vector<2x1x16xf32>
    %127 = vector.broadcast %124 : vector<2x16x1xf32> to vector<2x16x16xf32>
    %128 = vector.broadcast %126 : vector<2x1x16xf32> to vector<2x16x16xf32>
    %129 = arith.mulf %127, %128 : vector<2x16x16xf32>
    %130 = arith.addf %122, %129 : vector<2x16x16xf32>
    %131 = vector.extract_strided_slice %71 {offsets = [0, 2], sizes = [2, 16], strides = [1, 1]} : vector<2x20xf32> to vector<2x16xf32>
    %132 = vector.shape_cast %131 : vector<2x16xf32> to vector<2x16x1xf32>
    %133 = vector.extract_strided_slice %67 {offsets = [0, 32], sizes = [2, 16], strides = [1, 1]} : vector<2x80xf32> to vector<2x16xf32>
    %134 = vector.shape_cast %133 : vector<2x16xf32> to vector<2x1x16xf32>
    %135 = vector.broadcast %132 : vector<2x16x1xf32> to vector<2x16x16xf32>
    %136 = vector.broadcast %134 : vector<2x1x16xf32> to vector<2x16x16xf32>
    %137 = arith.mulf %135, %136 : vector<2x16x16xf32>
    %138 = arith.addf %130, %137 : vector<2x16x16xf32>
    %139 = vector.extract_strided_slice %71 {offsets = [0, 3], sizes = [2, 16], strides = [1, 1]} : vector<2x20xf32> to vector<2x16xf32>
    %140 = vector.shape_cast %139 : vector<2x16xf32> to vector<2x16x1xf32>
    %141 = vector.extract_strided_slice %67 {offsets = [0, 48], sizes = [2, 16], strides = [1, 1]} : vector<2x80xf32> to vector<2x16xf32>
    %142 = vector.shape_cast %141 : vector<2x16xf32> to vector<2x1x16xf32>
    %143 = vector.broadcast %140 : vector<2x16x1xf32> to vector<2x16x16xf32>
    %144 = vector.broadcast %142 : vector<2x1x16xf32> to vector<2x16x16xf32>
    %145 = arith.mulf %143, %144 : vector<2x16x16xf32>
    %146 = arith.addf %138, %145 : vector<2x16x16xf32>
    %147 = vector.extract_strided_slice %71 {offsets = [0, 4], sizes = [2, 16], strides = [1, 1]} : vector<2x20xf32> to vector<2x16xf32>
    %148 = vector.shape_cast %147 : vector<2x16xf32> to vector<2x16x1xf32>
    %149 = vector.extract_strided_slice %67 {offsets = [0, 64], sizes = [2, 16], strides = [1, 1]} : vector<2x80xf32> to vector<2x16xf32>
    %150 = vector.shape_cast %149 : vector<2x16xf32> to vector<2x1x16xf32>
    %151 = vector.broadcast %148 : vector<2x16x1xf32> to vector<2x16x16xf32>
    %152 = vector.broadcast %150 : vector<2x1x16xf32> to vector<2x16x16xf32>
    %153 = arith.mulf %151, %152 : vector<2x16x16xf32>
    %154 = arith.addf %146, %153 : vector<2x16x16xf32>
    %155 = math.tanh %154 : vector<2x16x16xf32>
    %c69 = arith.constant 69 : index
    %c128_34 = arith.constant 128 : index
    %156 = vector.load %arg2[%c69, %c128_34] : memref<80x576xf32, #tpu.memory_space<vmem>>, vector<1x16xf32>
    %157 = vector.shape_cast %156 : vector<1x16xf32> to vector<1x1x16xf32>
    %158 = vector.broadcast %157 : vector<1x1x16xf32> to vector<2x16x16xf32>
    %159 = arith.mulf %155, %158 : vector<2x16x16xf32>
    %cst_35 = arith.constant dense<0.000000e+00> : vector<2x16xf32>
    %160 = vector.multi_reduction <add>, %159, %cst_35 [2] : vector<2x16x16xf32> to vector<2x16xf32>
    %161 = arith.addf %160, %59 : vector<2x16xf32>
    %cst_36 = arith.constant dense<0xFF800000> : vector<2xf32>
    %162 = vector.multi_reduction <maximumf>, %161, %cst_36 [1] : vector<2x16xf32> to vector<2xf32>
    %163 = vector.shape_cast %162 : vector<2xf32> to vector<2x1xf32>
    %164 = vector.broadcast %163 : vector<2x1xf32> to vector<2x16xf32>
    %165 = arith.subf %161, %164 : vector<2x16xf32>
    %166 = math.exp %165 : vector<2x16xf32>
    %cst_37 = arith.constant dense<0.000000e+00> : vector<2xf32>
    %167 = vector.multi_reduction <add>, %166, %cst_37 [1] : vector<2x16xf32> to vector<2xf32>
    %168 = vector.shape_cast %167 : vector<2xf32> to vector<2x1xf32>
    %169 = vector.broadcast %168 : vector<2x1xf32> to vector<2x16xf32>
    %170 = arith.divf %166, %169 : vector<2x16xf32>
    %171 = vector.extract_strided_slice %170 {offsets = [0, 0], sizes = [1, 16], strides = [1, 1]} : vector<2x16xf32> to vector<1x16xf32>
    %c0_38 = arith.constant 0 : index
    %c0_39 = arith.constant 0 : index
    %c0_40 = arith.constant 0 : index
    %172 = vector.load %arg1[%c0_38, %c0_39, %c0_40] : memref<2x16x32xf32, #tpu.memory_space<vmem>>, vector<1x16x32xf32>
    %173 = vector.shape_cast %172 : vector<1x16x32xf32> to vector<16x32xf32>
    %cst_41 = arith.constant dense<0.000000e+00> : vector<1x32xf32>
    %174 = tpu.matmul %171, %173, %cst_41 {dimension_numbers = #tpu.dot_dimension_numbers<[1], [0], [0], [1], [0, 0, 1, 1], [], []>} : vector<1x16xf32>, vector<16x32xf32>, vector<1x32xf32> -> vector<1x32xf32>
    %175 = vector.extract_strided_slice %170 {offsets = [1, 0], sizes = [1, 16], strides = [1, 1]} : vector<2x16xf32> to vector<1x16xf32>
    %c1 = arith.constant 1 : index
    %c0_42 = arith.constant 0 : index
    %c0_43 = arith.constant 0 : index
    %176 = vector.load %arg1[%c1, %c0_42, %c0_43] : memref<2x16x32xf32, #tpu.memory_space<vmem>>, vector<1x16x32xf32>
    %177 = vector.shape_cast %176 : vector<1x16x32xf32> to vector<16x32xf32>
    %cst_44 = arith.constant dense<0.000000e+00> : vector<1x32xf32>
    %178 = tpu.matmul %175, %177, %cst_44 {dimension_numbers = #tpu.dot_dimension_numbers<[1], [0], [0], [1], [0, 0, 1, 1], [], []>} : vector<1x16xf32>, vector<16x32xf32>, vector<1x32xf32> -> vector<1x32xf32>
    %179 = tpu.concatenate %174, %178 in 0 : vector<1x32xf32>, vector<1x32xf32> -> vector<2x32xf32>
    %180 = tpu.concatenate %179, %54 in 1 : vector<2x32xf32>, vector<2x32xf32> -> vector<2x64xf32>
    %c0_45 = arith.constant 0 : index
    %c384 = arith.constant 384 : index
    %181 = vector.load %arg2[%c0_45, %c384] : memref<80x576xf32, #tpu.memory_space<vmem>>, vector<64x32xf32>
    %cst_46 = arith.constant dense<0.000000e+00> : vector<2x32xf32>
    %182 = tpu.matmul %180, %181, %cst_46 {dimension_numbers = #tpu.dot_dimension_numbers<[1], [0], [0], [1], [0, 0, 1, 1], [], []>} : vector<2x64xf32>, vector<64x32xf32>, vector<2x32xf32> -> vector<2x32xf32>
    %c70 = arith.constant 70 : index
    %c128_47 = arith.constant 128 : index
    %183 = vector.load %arg2[%c70, %c128_47] : memref<80x576xf32, #tpu.memory_space<vmem>>, vector<1x32xf32>
    %184 = vector.broadcast %183 : vector<1x32xf32> to vector<2x32xf32>
    %185 = arith.addf %182, %184 : vector<2x32xf32>
    %186 = tpu.concatenate %185, %5 in 1 : vector<2x32xf32>, vector<2x32xf32> -> vector<2x64xf32>
    %c0_48 = arith.constant 0 : index
    %c128_49 = arith.constant 128 : index
    %187 = vector.load %arg2[%c0_48, %c128_49] : memref<80x576xf32, #tpu.memory_space<vmem>>, vector<64x128xf32>
    %c71 = arith.constant 71 : index
    %c128_50 = arith.constant 128 : index
    %188 = vector.load %arg2[%c71, %c128_50] : memref<80x576xf32, #tpu.memory_space<vmem>>, vector<1x128xf32>
    %cst_51 = arith.constant dense<0.000000e+00> : vector<2x128xf32>
    %189 = tpu.matmul %186, %187, %cst_51 {dimension_numbers = #tpu.dot_dimension_numbers<[1], [0], [0], [1], [0, 0, 1, 1], [], []>} : vector<2x64xf32>, vector<64x128xf32>, vector<2x128xf32> -> vector<2x128xf32>
    %190 = vector.broadcast %188 : vector<1x128xf32> to vector<2x128xf32>
    %191 = arith.addf %189, %190 : vector<2x128xf32>
    %192 = vector.extract_strided_slice %191 {offsets = [0, 0], sizes = [2, 32], strides = [1, 1]} : vector<2x128xf32> to vector<2x32xf32>
    %193 = arith.negf %192 : vector<2x32xf32>
    %194 = math.exp %193 : vector<2x32xf32>
    %cst_52 = arith.constant 1.000000e+00 : f32
    %195 = vector.broadcast %cst_52 : f32 to vector<2x32xf32>
    %196 = arith.addf %195, %194 : vector<2x32xf32>
    %197 = arith.divf %195, %196 : vector<2x32xf32>
    %198 = vector.extract_strided_slice %191 {offsets = [0, 32], sizes = [2, 32], strides = [1, 1]} : vector<2x128xf32> to vector<2x32xf32>
    %199 = arith.negf %198 : vector<2x32xf32>
    %200 = math.exp %199 : vector<2x32xf32>
    %cst_53 = arith.constant 1.000000e+00 : f32
    %201 = vector.broadcast %cst_53 : f32 to vector<2x32xf32>
    %202 = arith.addf %201, %200 : vector<2x32xf32>
    %203 = arith.divf %201, %202 : vector<2x32xf32>
    %204 = vector.extract_strided_slice %191 {offsets = [0, 64], sizes = [2, 32], strides = [1, 1]} : vector<2x128xf32> to vector<2x32xf32>
    %205 = math.tanh %204 : vector<2x32xf32>
    %206 = vector.extract_strided_slice %191 {offsets = [0, 96], sizes = [2, 32], strides = [1, 1]} : vector<2x128xf32> to vector<2x32xf32>
    %207 = arith.negf %206 : vector<2x32xf32>
    %208 = math.exp %207 : vector<2x32xf32>
    %cst_54 = arith.constant 1.000000e+00 : f32
    %209 = vector.broadcast %cst_54 : f32 to vector<2x32xf32>
    %210 = arith.addf %209, %208 : vector<2x32xf32>
    %211 = arith.divf %209, %210 : vector<2x32xf32>
    %212 = arith.mulf %203, %6 : vector<2x32xf32>
    %213 = arith.mulf %197, %205 : vector<2x32xf32>
    %214 = arith.addf %212, %213 : vector<2x32xf32>
    %215 = math.tanh %214 : vector<2x32xf32>
    %216 = arith.mulf %211, %215 : vector<2x32xf32>
    %217 = arith.addf %185, %216 : vector<2x32xf32>
    %218 = tpu.concatenate %217, %7 in 1 : vector<2x32xf32>, vector<2x32xf32> -> vector<2x64xf32>
    %c0_55 = arith.constant 0 : index
    %c256_56 = arith.constant 256 : index
    %219 = vector.load %arg2[%c0_55, %c256_56] : memref<80x576xf32, #tpu.memory_space<vmem>>, vector<64x128xf32>
    %c72 = arith.constant 72 : index
    %c128_57 = arith.constant 128 : index
    %220 = vector.load %arg2[%c72, %c128_57] : memref<80x576xf32, #tpu.memory_space<vmem>>, vector<1x128xf32>
    %cst_58 = arith.constant dense<0.000000e+00> : vector<2x128xf32>
    %221 = tpu.matmul %218, %219, %cst_58 {dimension_numbers = #tpu.dot_dimension_numbers<[1], [0], [0], [1], [0, 0, 1, 1], [], []>} : vector<2x64xf32>, vector<64x128xf32>, vector<2x128xf32> -> vector<2x128xf32>
    %222 = vector.broadcast %220 : vector<1x128xf32> to vector<2x128xf32>
    %223 = arith.addf %221, %222 : vector<2x128xf32>
    %224 = vector.extract_strided_slice %223 {offsets = [0, 0], sizes = [2, 32], strides = [1, 1]} : vector<2x128xf32> to vector<2x32xf32>
    %225 = arith.negf %224 : vector<2x32xf32>
    %226 = math.exp %225 : vector<2x32xf32>
    %cst_59 = arith.constant 1.000000e+00 : f32
    %227 = vector.broadcast %cst_59 : f32 to vector<2x32xf32>
    %228 = arith.addf %227, %226 : vector<2x32xf32>
    %229 = arith.divf %227, %228 : vector<2x32xf32>
    %230 = vector.extract_strided_slice %223 {offsets = [0, 32], sizes = [2, 32], strides = [1, 1]} : vector<2x128xf32> to vector<2x32xf32>
    %231 = arith.negf %230 : vector<2x32xf32>
    %232 = math.exp %231 : vector<2x32xf32>
    %cst_60 = arith.constant 1.000000e+00 : f32
    %233 = vector.broadcast %cst_60 : f32 to vector<2x32xf32>
    %234 = arith.addf %233, %232 : vector<2x32xf32>
    %235 = arith.divf %233, %234 : vector<2x32xf32>
    %236 = vector.extract_strided_slice %223 {offsets = [0, 64], sizes = [2, 32], strides = [1, 1]} : vector<2x128xf32> to vector<2x32xf32>
    %237 = math.tanh %236 : vector<2x32xf32>
    %238 = vector.extract_strided_slice %223 {offsets = [0, 96], sizes = [2, 32], strides = [1, 1]} : vector<2x128xf32> to vector<2x32xf32>
    %239 = arith.negf %238 : vector<2x32xf32>
    %240 = math.exp %239 : vector<2x32xf32>
    %cst_61 = arith.constant 1.000000e+00 : f32
    %241 = vector.broadcast %cst_61 : f32 to vector<2x32xf32>
    %242 = arith.addf %241, %240 : vector<2x32xf32>
    %243 = arith.divf %241, %242 : vector<2x32xf32>
    %244 = arith.mulf %235, %8 : vector<2x32xf32>
    %245 = arith.mulf %229, %237 : vector<2x32xf32>
    %246 = arith.addf %244, %245 : vector<2x32xf32>
    %247 = math.tanh %246 : vector<2x32xf32>
    %248 = arith.mulf %243, %247 : vector<2x32xf32>
    %249 = arith.addf %217, %248 : vector<2x32xf32>
    %c0_62 = arith.constant 0 : index
    %c480 = arith.constant 480 : index
    %250 = vector.load %arg2[%c0_62, %c480] : memref<80x576xf32, #tpu.memory_space<vmem>>, vector<32x16xf32>
    %cst_63 = arith.constant dense<0.000000e+00> : vector<2x16xf32>
    %251 = tpu.matmul %249, %250, %cst_63 {dimension_numbers = #tpu.dot_dimension_numbers<[1], [0], [0], [1], [0, 0, 1, 1], [], []>} : vector<2x32xf32>, vector<32x16xf32>, vector<2x16xf32> -> vector<2x16xf32>
    %252 = tpu.concatenate %251, %179, %54, %52, %216, %214, %248, %246, %170 in 1 : vector<2x16xf32>, vector<2x32xf32>, vector<2x32xf32>, vector<2x32xf32>, vector<2x32xf32>, vector<2x32xf32>, vector<2x32xf32>, vector<2x32xf32>, vector<2x16xf32> -> vector<2x256xf32>
    %c0_64 = arith.constant 0 : index
    %c0_65 = arith.constant 0 : index
    %253 = vector.load %arg3[%c0_64, %c0_65] : memref<2x256xf32, #tpu.memory_space<vmem>>, vector<2x256xf32>
    tpu.vector_store %arg3[%c0_64, %c0_65], %252 {strides = array<i32>} : memref<2x256xf32, #tpu.memory_space<vmem>>, vector<2x256xf32>,
    return
  }
}

</mosaic_0001>

<bundles_post_ra>
// kernel: decoder_step.1
= control target key start
LH: loop header
LB: loop body
LE: loop exit
PB: predicated region body
PF: predicated region fallthrough
CT: control target
= control target key end

     0   :  { %8 = vsyncpa [#allocation3], 0  ;;  %s2636_s0 = inlined_call_operand.vmem [shape: f32[2,248], index: 0, kind: input, shape index: {}]   ;;  %s2637_s1 = inlined_call_operand.hbm [shape: f32[2,16,32], index: 1, kind: input, shape index: {}]   ;;  %s2638_s2 = inlined_call_operand.hbm [shape: f32[80,576], index: 2, kind: input, shape index: {}]   ;;  %s2639_s3 = inlined_call_operand.vmem [shape: f32[2,256], index: 3, kind: output, shape index: {}]  }
   0x1   :  { %9 = vsyncpa [#allocation5], 0  ;;  %s2182_s12 = smov [#allocation2]  }
   0x2   :  { %s17_s13 = sshll.u32 %s2182_s12, 4  ;;  %s18_s13 = int_to_ptr.vmem [resolvable:$true] %s17_s13 }
   0x3   :  { %s2146_s14 = scalar_lea.vmem %s18_s13, 512  ;;  %p2151_p1 = scmp.lt.s32.totalorder %s18_s13, %s18_s13 }
   0x4   :  { %p2147_p0 = scmp.ne.s32.totalorder %s18_s13, %s2146_s14  ;;  %p2152_p2 = scmp.lt.s32.totalorder %s2146_s14, %s2146_s14 }
   0x6   :  { %p2153_p3 = por %p2152_p2, %p2151_p1 }
   0x8   :  { %p2154_p4 = pnand %p2153_p3, %p2147_p0 }
   0xa   :  { %2157 = shalt.err (!%p2154_p4)
}
   0xb   :  { %s2183_s15 = smov 128   ;;  %s2184_s16 = smov 8  }
   0xc   :  { %23 = dma.hbm_to_vmem [thread:$0]  %s2637_s1, 512, %s18_s13, [#allocation3], %s2183_s15, %s2183_s15, %s2184_s16  }
   0xd   :  { %s2185_s19 = smov [#allocation4]  }
   0xe   :  { %s29_s20 = sshll.u32 %s2185_s19, 4  ;;  %s30_s20 = int_to_ptr.vmem [resolvable:$true] %s29_s20 }
   0xf   :  { %s2166_s21 = scalar_lea.vmem %s30_s20, 6400  ;;  %p2171_p6 = scmp.lt.s32.totalorder %s30_s20, %s30_s20 }
  0x10   :  { %p2167_p5 = scmp.ne.s32.totalorder %s30_s20, %s2166_s21  ;;  %p2172_p7 = scmp.lt.s32.totalorder %s2166_s21, %s2166_s21 }
  0x12   :  { %p2173_p8 = por %p2172_p7, %p2171_p6 }
  0x14   :  { %p2174_p9 = pnand %p2173_p8, %p2167_p5 }
  0x16   :  { %2177 = shalt.err (!%p2174_p9)
}
  0x17   :  { %s2186_s22 = smov 640   ;;  %s2187_s23 = smov 40  }
  0x18   :  { %35 = dma.hbm_to_vmem [thread:$0]  %s2638_s2, 6400, %s30_s20, [#allocation5], %s2186_s22, %s2186_s22, %s2187_s23  }
  0x19   :  { %2178 = dma.done.wait [#allocation3], 512  }
  0x1a   :  { %2179 = vsyncadd [#allocation3], 4294966784 }
  0x1b   :  { %2180 = dma.done.wait [#allocation5], 6400  }
  0x1c   :  { %2181 = vsyncadd [#allocation5], 4294960896  ;;  %v2188_v0 = vmov 0.0   ;;  %vm2189_vm0 = vmmov 0   ;;  %v2238_v1 = vld [vmem:[#allocation4 + $0x18] sm:$0xff]  ;;  %s2190_s1 = smov 96   ;;  %v223_v18 = vlaneseq }
  0x1d   :  { %1919 = vmatprep.subr.mxu1 %v2188_v0  ;;  %1921 = vmatprep.mubr.msk.f32.mxu1 %vm2189_vm0, %v2188_v0  ;;  %v2242_v2 = vld [vmem:[#allocation4 + $0x68] sm:$0xff]  ;;  %v2244_v3 = vld [vmem:[#allocation4 + $0x90] sm:$0xff]  ;;  %s2191_s2 = smov 64   ;;  %v2248_v4 = vld [vmem:[#allocation4 + $0x40] sm:$0xff]  ;;  %vm49_vm1 = vcmask 64512   ;;  %vm145_vm2 = vcmask 261120  }
  0x1e   :  { %1935 = vmatprep.subr.mxu0 %v2188_v0  ;;  %1955 = vmatprep.mubr.msk.f32.mxu0 %vm2189_vm0, %v2188_v0  ;;  %v42_v5 = vld [vmem:[%s2636_s0] sm:$0xf]  ;;  %v44_v11 = vld [vmem:[#allocation4 + $0x148] ss:$0 sm:$0xff]  ;;  %v2192_v16 = vmov 1983009808  }
  0x1f   :  { %46 = vrot.lane.b32.xlu0 %v2238_v1, %s2190_s1  ;;  %137 = vrot.lane.b32.xlu1 %v2242_v2, %s2191_s2  ;;  %v221_v17 = vunpack.c.l.s4 %v2192_v16  ;;  %v2270_v20 = vshrl.u32 %v223_v18, 7  ;;  %s2193_s0 = smov 120   ;;  %v249_v23 = vld [vmem:[#allocation4 + $0x168] sm:$0xff]  ;;  %v248_v24 = vld [vmem:[#allocation4 + $0x140] sm:$0xff]  ;;  %v247_v25 = vld [vmem:[#allocation4 + $0x118] sm:$0xff]  ;;  %s2194_s28 = smov 88  }
  0x20   :  { %1936 = vmatpush3.msra.mxu0 %v249_v23  ;;  %v246_v26 = vld [vmem:[#allocation4 + $0xf0] sm:$0xff]  ;;  %v245_v27 = vld [vmem:[#allocation4 + $0xc8] sm:$0xff]  ;;  %v244_v28 = vld [vmem:[#allocation4 + $0xa0] sm:$0xff]  ;;  %s2195_s29 = smov 32   ;;  %vm238_vm3 = vcmask 392192   ;;  %vm251_vm4 = vcmask 654336  }
  0x21   :  { %v222_v19 = vunpack.c.0.s8 %v221_v17  ;;  %1937 = vmatprep.subr.mxu0 %v2188_v0  ;;  %v243_v29 = vld [vmem:[#allocation4 + $0x78] sm:$0xff]  ;;  %v242_v30 = vld [vmem:[#allocation4 + $0x50] sm:$0xff]  ;;  %v241_v31 = vld [vmem:[#allocation4 + $0x28] sm:$0xff]  ;;  %s2196_s30 = smov 24   ;;  %s2197_s4 = smov 48   ;;  %vm357_vm5 = vcmask 130048  }
  0x22   :  { %1938 = vmatpush3.msra.mxu0 %v248_v24  ;;  %v240_v32 = vld [vmem:[#allocation4] sm:$0xff]  ;;  %v128_v33 = vld [vmem:[#allocation4 + $0x149] ss:$0 sm:$0xff]  ;;  %v250_v43 = vld [vmem:[#allocation4 + $0x14a] ss:$0 sm:$0xff]  ;;  %s2198_s5 = smov 16  }
  0x23   :  { %139 = vrot.lane.b32.xlu0 %v2244_v3, %s2191_s2  ;;  %135 = vrot.lane.b32.xlu1 %v2248_v4, %s2191_s2  ;;  %v225_v21 = vsub.s32 %v222_v19, %v2270_v20  ;;  %v353_v59 = vld [vmem:[#allocation4 + $0x178] sm:$0xff]  ;;  %v352_v60 = vld [vmem:[#allocation4 + $0x150] sm:$0xff]  ;;  %s2199_s6 = smov 26   ;;  %vm626_vm6 = vcmask 15360   ;;  %vm628_vm7 = vcmask 146432   ;;  %s2200_s7 = smov 112  }
  0x24   :  { %1939 = vmatprep.subr.mxu0 %v2188_v0  ;;  %s2202_s8 = smov 80   ;;  %vm1058_vm8 = vcmask 130112   ;;  %vm1069_vm9 = vcmask 1041409   ;;  %vm1072_vm10 = vcmask 123904   ;;  %vm1796_vm11 = vcmask 1048512   ;;  %s2204_s9 = smov 56  }
  0x25   :  { %v2273_v22 = vrot.slane %v42_v5, %v225_v21  ;;  %1940 = vmatpush3.msra.mxu0 %v247_v25  ;;  %vm1341_vm12 = vcmask 1040384   ;;  %vm1356_vm13 = vcmask 523264   ;;  %vm1434_vm14 = vcmask 457728  }
  0x26   :  { %1941 = vmatprep.subr.mxu0 %v2188_v0  ;;  %vm1812_vm15 = vcmask 916480  }
  0x27   :  { %133 = vrot.lane.b32.xlu0 %v2238_v1, %s2191_s2  ;;  %227 = vrot.lane.b32.xlu1 %v2273_v22, %s2193_s0  ;;  %v2301_v54 = vcombine.high %v2273_v22, %v2273_v22 }
  0x28   :  { %1942 = vmatpush3.msra.mxu0 %v246_v26 }
  0x29   :  { %1943 = vmatprep.subr.mxu0 %v2188_v0 }
  0x2a   :  { %1944 = vmatpush3.msra.mxu0 %v245_v27  ;;  %v653_v27 = vld [vmem:[#allocation4 + $0x150] ss:$0 sm:$0xff] }
  0x2b   :  { %234 = vrot.lane.b32.xlu1 %v2273_v22, %s2184_s16  ;;  %1945 = vmatprep.subr.mxu0 %v2188_v0 }
  0x2c   :  { %1946 = vmatpush3.msra.mxu0 %v244_v28 }
  0x2d   :  { %1947 = vmatprep.subr.mxu0 %v2188_v0 }
  0x2e   :  { %1948 = vmatpush3.msra.mxu0 %v243_v29 }
  0x2f   :  { %1949 = vmatprep.subr.mxu0 %v2188_v0  ;;  %332 = vrot.lane.b32.xlu1 %v2273_v22, %s2194_s28 }
  0x30   :  { %1950 = vmatpush3.msra.mxu0 %v242_v30 }
  0x31   :  { %1951 = vmatprep.subr.mxu0 %v2188_v0 }
  0x32   :  { %1952 = vmatpush3.msra.mxu0 %v241_v31 }
  0x33   :  { %1953 = vmatprep.subr.mxu0 %v2188_v0 }
  0x34   :  { %1954 = vmatpush3.msra.mxu0 %v240_v32 }
  0x35   :  { %1983 = vmatprep.subr.mxu0 %v2188_v0 }
  0x91   :  { %v47_v6 = vpop.permute.xlu0 %46  ;;  %v138_v8 = vpop.permute.xlu1 %137 }
  0x92   :  { %1920 = vmatpush3.msra.mxu1 %v47_v6  ;;  %v533_v6 = vld [vmem:[#allocation4 + $0x48] sm:$0xff] }
  0x93   :  { %1922 = vmatmul.mubr.msk.f32.vlgmr.msra.gmra.mxu1 %vm49_vm1, %v42_v5  ;;  %1924 = vmatprep.subr.mxu1 %v2188_v0 }
  0x94   :  { %1932 = vmatprep.mubr.msk.f32.mxu1 %vm2189_vm0, %v2188_v0 }
  0x95   :  { %v140_v7 = vpop.permute.xlu0 %139  ;;  %v136_v9 = vpop.permute.xlu1 %135 }
  0x96   :  { %1925 = vmatpush3.msra.mxu1 %v140_v7  ;;  %v531_v7 = vld [vmem:[#allocation4 + $0x20] sm:$0xff] }
  0x97   :  { %1926 = vmatprep.subr.mxu1 %v2188_v0 }
  0x98   :  { %1927 = vmatpush3.msra.mxu1 %v138_v8 }
  0x99   :  { %1928 = vmatprep.subr.mxu1 %v2188_v0  ;;  %v134_v10 = vpop.permute.xlu0 %133  ;;  %v228_v38 = vpop.permute.xlu1 %227 }
  0x9a   :  { %1929 = vmatpush3.msra.mxu1 %v136_v9 }
  0x9b   :  { %1930 = vmatprep.subr.mxu1 %v2188_v0 }
  0x9c   :  { %1931 = vmatpush3.msra.mxu1 %v134_v10 }
  0x9d   :  { %1958 = vmatprep.subr.mxu1 %v2188_v0  ;;  %v235_v39 = vpop.permute.xlu1 %234 }
  0xa1   :  { %v333_v55 = vpop.permute.xlu1 %332 }
 0x153   :  { %v119_v12 = vpop.f32.mrf.mxu1 }
 0x154   :  { %v120_v13 = vadd.f32 %v119_v12, %v44_v11  ;;  %v2342_v12 = vsub.s32 0, %v2270_v20 }
 0x155   :  { %v1923_v14 = vpop.f32.mrf.mxu1 }
 0x156   :  { %v123_v15 = vmax.f32 %v120_v13, 0.0  ;;  %v2345_v14 = vsub.s32 1, %v2270_v20 }
 0x158   :  { %1933 = vmatmul.mubr.msk.f32.vlgmr.msra.gmra.mxu1 %vm145_vm2, %v123_v15 }
 0x159   :  { %1962 = vmatprep.mubr.msk.f32.mxu1 %vm2189_vm0, %v2188_v0  ;;  %1959 = vmatpush3.msra.mxu1 %v353_v59 }
 0x15a   :  { %1960 = vmatprep.subr.mxu1 %v2188_v0 }
 0x15b   :  { %1961 = vmatpush3.msra.mxu1 %v352_v60 }
 0x15c   :  { %1965 = vmatprep.subr.mxu1 %v2188_v0 }
 0x218   :  { %v215_v34 = vpop.f32.mrf.mxu1 }
 0x219   :  { %v216_v35 = vadd.f32 %v215_v34, %v128_v33 }
 0x21a   :  { %v1934_v36 = vpop.f32.mrf.mxu1 }
 0x21b   :  { %v219_v37 = vmax.f32 %v216_v35, 0.0  ;;  %v694_v36 = vld [vmem:[#allocation4 + $0x151] ss:$0 sm:$0xff] }
 0x21d   :  { %231 = vrot.lane.b32.xlu0 %v219_v37, %s2195_s29 }
 0x28f   :  { %v232_v40 = vpop.permute.xlu0 %231 }
 0x290   :  { %v237_v41 = vsel %vm145_vm2, %v228_v38, %v232_v40 }
 0x291   :  { %v239_v42 = vsel %vm238_vm3, %v237_v41, %v235_v39 }
 0x292   :  { %1956 = vmatmul.mubr.msk.f32.vlgmr.msra.gmra.mxu0 %vm251_vm4, %v239_v42 }
 0x293   :  { %1987 = vmatprep.mubr.msk.f32.mxu0 %vm2189_vm0, %v2188_v0 }
 0x352   :  { %v321_v44 = vpop.f32.mrf.mxu0 }
 0x353   :  { %v322_v45 = vadd.f32 %v321_v44, %v250_v43 }
 0x354   :  { %v1957_v46 = vpop.f32.mrf.mxu0 }
 0x355   :  { %2090 = vtanh.f32 %v322_v45  ;;  %v1839_v48 = vmul.f32 -1.442695, %v322_v45  ;;  %v735_v45 = vld [vmem:[#allocation4 + $0x152] ss:$0 sm:$0xff] }
 0x357   :  { %2092 = vpow2.f32 %v1839_v48 }
 0x362   :  { %v2091_v47 = vpop.eup %2090 }
 0x363   :  { %337 = vrot.lane.b32.xlu0 %v2091_v47, %s2191_s2 }
 0x364   :  { %v2093_v49 = vpop.eup %2092 }
 0x365   :  { %v328_v50 = vadd.f32 1.0, %v2093_v49 }
 0x367   :  { %2094 = vrcp.f32 %v328_v50 }
 0x374   :  { %v2095_v51 = vpop.eup %2094 }
 0x375   :  { %v335_v56 = vmul.f32 %v2095_v51, %v333_v55  ;;  %v776_v55 = vld [vmem:[#allocation4 + $0x153] ss:$0 sm:$0xff] }
 0x3d5   :  { %v338_v52 = vpop.permute.xlu0 %337 }
 0x3d6   :  { %v340_v53 = vmul.f32 %v2095_v51, %v338_v52 }
 0x3d8   :  { %342 = vrot.lane.b32.xlu0 %v340_v53, %s2195_s29 }
 0x3dc   :  { %355 = vrot.lane.b32.xlu0 %v2301_v54, %s2196_s30 }
 0x3e0   :  { %449 = vrot.lane.b32.xlu0 %v2242_v2, %s2197_s4 }
 0x3e4   :  { %445 = vrot.lane.b32.xlu0 %v2238_v1, %s2197_s4 }
 0x3e8   :  { %542 = vrot.lane.b32.xlu0 %v2248_v4, %s2198_s5 }
 0x3ec   :  { %538 = vrot.lane.b32.xlu0 %v2238_v1, %s2198_s5 }
 0x3f0   :  { %623 = vrot.lane.b32.xlu0 %v2301_v54, %s2199_s6 }
 0x44a   :  { %v343_v57 = vpop.permute.xlu0 %342 }
 0x44b   :  { %v2308_v58 = vadd.f32 %v343_v57, %v335_v56 }
 0x44d   :  { %2096 = vtanh.f32 %v2308_v58 }
 0x44e   :  { %v2311_v61 = vpop.permute.xlu0 %355 }
 0x44f   :  { %1963 = vmatmul.mubr.msk.f32.vlgmr.msra.gmra.mxu1 %vm357_vm5, %v2311_v61 }
 0x450   :  { %1973 = vmatprep.mubr.msk.f32.mxu1 %vm2189_vm0, %v2188_v0 }
 0x452   :  { %v450_v5 = vpop.permute.xlu0 %449 }
 0x45a   :  { %v2097_v62 = vpop.eup %2096 }
 0x45b   :  { %348 = vrot.lane.b32.xlu1 %v2097_v62, %s2191_s2 }
 0x45f   :  { %451 = vrot.lane.b32.xlu1 %v2244_v3, %s2197_s4 }
 0x463   :  { %447 = vrot.lane.b32.xlu1 %v2248_v4, %s2197_s4  ;;  %v446_v4 = vpop.permute.xlu0 %445 }
 0x467   :  { %v543_v10 = vpop.permute.xlu0 %542 }
 0x46b   :  { %v539_v11 = vpop.permute.xlu0 %538 }
 0x46f   :  { %v624_v13 = vpop.permute.xlu0 %623 }
 0x470   :  { %v627_v15 = vsel %vm626_vm6, 0.0, %v624_v13 }
 0x471   :  { %v629_v16 = vsel %vm628_vm7, %v627_v15, 0.0 }
 0x472   :  { %v634_v17 = vrot.slane %v629_v16, %v2342_v12  ;;  %v645_v21 = vrot.slane %v629_v16, %v2345_v14  ;;  %v437_v16 = vld [vmem:[#allocation4 + $0x14b] ss:$0 sm:$0xff] }
 0x474   :  { %640 = vbcast.lane.b32.xlu0 %v634_v17, 264 }
 0x478   :  { %651 = vbcast.lane.b32.xlu0 %v645_v21, 264 }
 0x47c   :  { %684 = vbcast.lane.b32.xlu0 %v634_v17, 265 }
 0x480   :  { %692 = vbcast.lane.b32.xlu0 %v645_v21, 265 }
 0x484   :  { %725 = vbcast.lane.b32.xlu0 %v634_v17, 266 }
 0x488   :  { %733 = vbcast.lane.b32.xlu0 %v645_v21, 266 }
 0x48c   :  { %766 = vbcast.lane.b32.xlu0 %v634_v17, 267 }
 0x490   :  { %774 = vbcast.lane.b32.xlu0 %v645_v21, 267 }
 0x494   :  { %807 = vbcast.lane.b32.xlu0 %v634_v17, 268 }
 0x498   :  { %815 = vbcast.lane.b32.xlu0 %v645_v21, 268 }
 0x4cd   :  { %v349_v63 = vpop.permute.xlu1 %348 }
 0x4ce   :  { %v2329_v2 = vmul.f32 %v2095_v51, %v349_v63 }
 0x4d0   :  { %439 = vrot.lane.b32.xlu1 %v2329_v2, %s2195_s29 }
 0x4d1   :  { %v452_v3 = vpop.permute.xlu1 %451 }
 0x4d2   :  { %1966 = vmatpush3.msra.mxu1 %v452_v3 }
 0x4d3   :  { %1967 = vmatprep.subr.mxu1 %v2188_v0 }
 0x4d4   :  { %1968 = vmatpush3.msra.mxu1 %v450_v5  ;;  %544 = vrot.lane.b32.xlu1 %v533_v6, %s2198_s5  ;;  %v817_v6 = vld [vmem:[#allocation4 + $0x154] ss:$0 sm:$0xff] }
 0x4d5   :  { %1969 = vmatprep.subr.mxu1 %v2188_v0  ;;  %v448_v1 = vpop.permute.xlu1 %447 }
 0x4d6   :  { %1970 = vmatpush3.msra.mxu1 %v448_v1 }
 0x4d7   :  { %1971 = vmatprep.subr.mxu1 %v2188_v0 }
 0x4d8   :  { %1972 = vmatpush3.msra.mxu1 %v446_v4  ;;  %540 = vrot.lane.b32.xlu1 %v531_v7, %s2198_s5 }
 0x4d9   :  { %1976 = vmatprep.subr.mxu1 %v2188_v0 }
 0x4dc   :  { %636 = vbcast.lane.b32.xlu1 %v634_v17, 256 }
 0x4e0   :  { %647 = vbcast.lane.b32.xlu1 %v645_v21, 256 }
 0x4e4   :  { %680 = vbcast.lane.b32.xlu1 %v634_v17, 257 }
 0x4e6   :  { %v2356_v28 = vpop.permute.xlu0 %640 }
 0x4e7   :  { %v655_v29 = vmul.f32 %v653_v27, %v2356_v28 }
 0x4e8   :  { %688 = vbcast.lane.b32.xlu1 %v645_v21, 257 }
 0x4e9   :  { %664 = vrot.lane.b32.xlu0 %v655_v29, %s2200_s7 }
 0x4ea   :  { %v2364_v32 = vpop.permute.xlu0 %651 }
 0x4eb   :  { %v657_v33 = vmul.f32 %v653_v27, %v2364_v32 }
 0x4ec   :  { %721 = vbcast.lane.b32.xlu1 %v634_v17, 258 }
 0x4ed   :  { %668 = vrot.lane.b32.xlu0 %v657_v33, %s2200_s7 }
 0x4ee   :  { %v2372_v37 = vpop.permute.xlu0 %684 }
 0x4ef   :  { %v696_v38 = vmul.f32 %v694_v36, %v2372_v37 }
 0x4f0   :  { %729 = vbcast.lane.b32.xlu1 %v645_v21, 258 }
 0x4f1   :  { %705 = vrot.lane.b32.xlu0 %v696_v38, %s2200_s7 }
 0x4f2   :  { %v2380_v41 = vpop.permute.xlu0 %692 }
 0x4f3   :  { %v698_v42 = vmul.f32 %v694_v36, %v2380_v41 }
 0x4f4   :  { %762 = vbcast.lane.b32.xlu1 %v634_v17, 259 }
 0x4f5   :  { %709 = vrot.lane.b32.xlu0 %v698_v42, %s2200_s7 }
 0x4f6   :  { %v726_v46 = vpop.permute.xlu0 %725 }
 0x4f7   :  { %v737_v47 = vmul.f32 %v735_v45, %v726_v46 }
 0x4f8   :  { %770 = vbcast.lane.b32.xlu1 %v645_v21, 259 }
 0x4f9   :  { %746 = vrot.lane.b32.xlu0 %v737_v47, %s2200_s7 }
 0x4fa   :  { %v2390_v50 = vpop.permute.xlu0 %733 }
 0x4fb   :  { %v739_v51 = vmul.f32 %v735_v45, %v2390_v50 }
 0x4fc   :  { %803 = vbcast.lane.b32.xlu1 %v634_v17, 260 }
 0x4fd   :  { %750 = vrot.lane.b32.xlu0 %v739_v51, %s2200_s7 }
 0x4fe   :  { %v767_v56 = vpop.permute.xlu0 %766 }
 0x4ff   :  { %v778_v57 = vmul.f32 %v776_v55, %v767_v56 }
 0x500   :  { %811 = vbcast.lane.b32.xlu1 %v645_v21, 260 }
 0x501   :  { %787 = vrot.lane.b32.xlu0 %v778_v57, %s2200_s7 }
 0x502   :  { %v2400_v62 = vpop.permute.xlu0 %774 }
 0x503   :  { %v780_v63 = vmul.f32 %v776_v55, %v2400_v62 }
 0x505   :  { %791 = vrot.lane.b32.xlu0 %v780_v63, %s2200_s7 }
 0x506   :  { %v808_v1 = vpop.permute.xlu0 %807 }
 0x507   :  { %v819_v4 = vmul.f32 %v817_v6, %v808_v1 }
 0x509   :  { %828 = vrot.lane.b32.xlu0 %v819_v4, %s2200_s7 }
 0x50f   :  { %v2339_v8 = vpop.f32.mrf.mxu1 }
 0x510   :  { %v430_v47 = vmax.f32 %v2339_v8, 1e-06 }
 0x511   :  { %v1964_v9 = vpop.f32.mrf.mxu1 }
 0x542   :  { %v440_v19 = vpop.permute.xlu1 %439 }
 0x543   :  { %1974 = vmatmul.mubr.msk.f32.vlgmr.msra.gmra.mxu1 %vm145_vm2, %v440_v19 }
 0x544   :  { %1980 = vmatprep.mubr.msk.f32.mxu1 %vm2189_vm0, %v2188_v0 }
 0x546   :  { %v545_v23 = vpop.permute.xlu1 %544 }
 0x547   :  { %v547_v24 = vsel %vm357_vm5, %v543_v10, %v545_v23  ;;  %v816_v10 = vpop.permute.xlu0 %815 }
 0x548   :  { %1977 = vmatpush3.msra.mxu1 %v547_v24  ;;  %v2201_v24 = vmov 1966171168  }
 0x549   :  { %1978 = vmatprep.subr.mxu1 %v2188_v0 }
 0x54a   :  { %v541_v25 = vpop.permute.xlu1 %540 }
 0x54b   :  { %v546_v26 = vsel %vm357_vm5, %v539_v11, %v541_v25  ;;  %v821_v11 = vmul.f32 %v817_v6, %v816_v10  ;;  %v844_v25 = vunpack.c.l.s4 %v2201_v24 }
 0x54c   :  { %1979 = vmatpush3.msra.mxu1 %v546_v26 }
 0x54d   :  { %1990 = vmatprep.subr.mxu1 %v2188_v0  ;;  %832 = vrot.lane.b32.xlu0 %v821_v11, %s2200_s7  ;;  %v845_v26 = vunpack.c.0.s8 %v844_v25 }
 0x54e   :  { %v2359_v30 = vpop.permute.xlu1 %636 }
 0x54f   :  { %v654_v31 = vmul.f32 %v653_v27, %v2359_v30 }
 0x551   :  { %662 = vrot.lane.b32.xlu1 %v654_v31, %s2200_s7 }
 0x552   :  { %v2367_v34 = vpop.permute.xlu1 %647 }
 0x553   :  { %v656_v35 = vmul.f32 %v653_v27, %v2367_v34  ;;  %v848_v27 = vsub.s32 %v845_v26, %v2270_v20 }
 0x555   :  { %666 = vrot.lane.b32.xlu1 %v656_v35, %s2200_s7 }
 0x556   :  { %v2375_v39 = vpop.permute.xlu1 %680 }
 0x557   :  { %v695_v40 = vmul.f32 %v694_v36, %v2375_v39 }
 0x559   :  { %703 = vrot.lane.b32.xlu1 %v695_v40, %s2200_s7 }
 0x55a   :  { %v2383_v43 = vpop.permute.xlu1 %688 }
 0x55b   :  { %v697_v44 = vmul.f32 %v694_v36, %v2383_v43 }
 0x55d   :  { %707 = vrot.lane.b32.xlu1 %v697_v44, %s2200_s7 }
 0x55e   :  { %v722_v48 = vpop.permute.xlu1 %721 }
 0x55f   :  { %v736_v49 = vmul.f32 %v735_v45, %v722_v48 }
 0x561   :  { %744 = vrot.lane.b32.xlu1 %v736_v49, %s2200_s7 }
 0x562   :  { %v2393_v52 = vpop.permute.xlu1 %729 }
 0x563   :  { %v738_v53 = vmul.f32 %v735_v45, %v2393_v52 }
 0x565   :  { %748 = vrot.lane.b32.xlu1 %v738_v53, %s2200_s7 }
 0x566   :  { %v763_v59 = vpop.permute.xlu1 %762 }
 0x567   :  { %v777_v60 = vmul.f32 %v776_v55, %v763_v59 }
 0x569   :  { %785 = vrot.lane.b32.xlu1 %v777_v60, %s2200_s7 }
 0x56a   :  { %v2403_v5 = vpop.permute.xlu1 %770 }
 0x56b   :  { %v779_v3 = vmul.f32 %v776_v55, %v2403_v5 }
 0x56d   :  { %789 = vrot.lane.b32.xlu1 %v779_v3, %s2200_s7 }
 0x56e   :  { %v804_v7 = vpop.permute.xlu1 %803 }
 0x56f   :  { %v818_v9 = vmul.f32 %v817_v6, %v804_v7 }
 0x571   :  { %826 = vrot.lane.b32.xlu1 %v818_v9, %s2200_s7 }
 0x572   :  { %v812_v13 = vpop.permute.xlu1 %811 }
 0x573   :  { %v820_v15 = vmul.f32 %v817_v6, %v812_v13 }
 0x575   :  { %830 = vrot.lane.b32.xlu1 %v820_v15, %s2200_s7 }
 0x5c3   :  { %v663_v63 = vpop.permute.xlu1 %662 }
 0x5c7   :  { %v667_v3 = vpop.permute.xlu1 %666 }
 0x603   :  { %v525_v17 = vpop.f32.mrf.mxu1 }
 0x604   :  { %v526_v19 = vadd.f32 %v525_v17, %v437_v16  ;;  %v630_v17 = vld [vmem:[#allocation4 + $0x14c] ss:$0 sm:$0xff] }
 0x605   :  { %v1975_v21 = vpop.f32.mrf.mxu1  ;;  %v674_v24 = vadd.f32 %v663_v63, %v630_v17 }
 0x606   :  { %2098 = vtanh.f32 %v526_v19 }
 0x607   :  { %2100 = vlog2.f32 %v430_v47 }
 0x613   :  { %v2099_v23 = vpop.eup %2098 }
 0x614   :  { %1981 = vmatmul.mubr.msk.f32.vlgmr.msra.gmra.mxu1 %vm357_vm5, %v2099_v23  ;;  %v2101_v57 = vpop.eup %2100 }
 0x615   :  { %1994 = vmatprep.mubr.msk.f32.mxu1 %vm2189_vm0, %v2188_v0 }
 0x6d4   :  { %v619_v29 = vpop.f32.mrf.mxu1 }
 0x6d5   :  { %v849_v31 = vrot.slane %v619_v29, %v848_v27 }
 0x6d6   :  { %v1982_v33 = vpop.f32.mrf.mxu1 }
 0x6d7   :  { %v857_v35 = vrot.slane %v849_v31, %v848_v27  ;;  %v850_v42 = vcombine.high %v849_v31, %v849_v31 }
 0x6d9   :  { %v2417_v36 = vrot.slane %v857_v35, %v2342_v12  ;;  %v864_v49 = vrot.slane %v850_v42, %v848_v27 }
 0x6db   :  { %v884_v38 = vmul.f32 %v2417_v36, %v2372_v37  ;;  %v883_v40 = vmul.f32 %v2417_v36, %v2375_v39  ;;  %v908_v44 = vmul.f32 %v2417_v36, %v726_v46  ;;  %v907_v45 = vmul.f32 %v2417_v36, %v722_v48 }
 0x6dc   :  { %v932_v37 = vmul.f32 %v2417_v36, %v767_v56  ;;  %v931_v39 = vmul.f32 %v2417_v36, %v763_v59  ;;  %v2435_v46 = vrot.slane %v864_v49, %v2342_v12  ;;  %v956_v48 = vmul.f32 %v2417_v36, %v808_v1  ;;  %v704_v1 = vpop.permute.xlu1 %703 }
 0x6dd   :  { %893 = vrot.lane.b32.xlu0 %v884_v38, %s2200_s7  ;;  %891 = vrot.lane.b32.xlu1 %v883_v40, %s2200_s7  ;;  %v955_v51 = vmul.f32 %v2417_v36, %v804_v7  ;;  %v715_v26 = vadd.f32 %v704_v1, %v674_v24 }
 0x6de   :  { %v886_v8 = vmul.f32 %v2435_v46, %v2380_v41  ;;  %v885_v53 = vmul.f32 %v2435_v46, %v2383_v43  ;;  %v910_v55 = vmul.f32 %v2435_v46, %v2390_v50  ;;  %v909_v56 = vmul.f32 %v2435_v46, %v2393_v52 }
 0x6df   :  { %v934_v41 = vmul.f32 %v2435_v46, %v2400_v62  ;;  %v933_v43 = vmul.f32 %v2435_v46, %v2403_v5  ;;  %v958_v50 = vmul.f32 %v2435_v46, %v816_v10  ;;  %v957_v59 = vmul.f32 %v2435_v46, %v812_v13  ;;  %v665_v62 = vpop.permute.xlu0 %664 }
 0x6e0   :  { %v2461_v52 = vmul.f32 0.6931472, %v2101_v57  ;;  %v708_v7 = vpop.permute.xlu1 %707  ;;  %v675_v23 = vadd.f32 %v665_v62, %v630_v17 }
 0x6e1   :  { %917 = vrot.lane.b32.xlu0 %v908_v44, %s2190_s1  ;;  %915 = vrot.lane.b32.xlu1 %v907_v45, %s2190_s1  ;;  %v676_v45 = vadd.f32 %v667_v3, %v630_v17 }
 0x6e2   :  { %v1004_v60 = vrot.slane %v2461_v52, %v2342_v12 }
 0x6e3   :  { %v669_v5 = vpop.permute.xlu0 %668 }
 0x6e4   :  { %v745_v10 = vpop.permute.xlu1 %744  ;;  %v677_v44 = vadd.f32 %v669_v5, %v630_v17 }
 0x6e5   :  { %941 = vrot.lane.b32.xlu0 %v932_v37, %s2202_s8  ;;  %939 = vrot.lane.b32.xlu1 %v931_v39, %s2202_s8  ;;  %v756_v33 = vadd.f32 %v745_v10, %v715_v26 }
 0x6e7   :  { %v706_v6 = vpop.permute.xlu0 %705 }
 0x6e8   :  { %v749_v13 = vpop.permute.xlu1 %748  ;;  %v716_v25 = vadd.f32 %v706_v6, %v675_v23 }
 0x6e9   :  { %965 = vrot.lane.b32.xlu0 %v956_v48, %s2191_s2  ;;  %963 = vrot.lane.b32.xlu1 %v955_v51, %s2191_s2  ;;  %v876_v48 = vmul.f32 %v2417_v36, %v2356_v28  ;;  %v875_v51 = vmul.f32 %v2417_v36, %v2359_v30 }
 0x6eb   :  { %v710_v4 = vpop.permute.xlu0 %709 }
 0x6ec   :  { %v786_v16 = vpop.permute.xlu1 %785 }
 0x6ed   :  { %897 = vrot.lane.b32.xlu0 %v886_v8, %s2200_s7  ;;  %895 = vrot.lane.b32.xlu1 %v885_v53, %s2200_s7  ;;  %v797_v42 = vadd.f32 %v786_v16, %v756_v33 }
 0x6ef   :  { %v747_v9 = vpop.permute.xlu0 %746 }
 0x6f0   :  { %v790_v21 = vpop.permute.xlu1 %789  ;;  %v757_v31 = vadd.f32 %v747_v9, %v716_v25 }
 0x6f1   :  { %921 = vrot.lane.b32.xlu0 %v910_v55, %s2190_s1  ;;  %919 = vrot.lane.b32.xlu1 %v909_v56, %s2190_s1  ;;  %v718_v55 = vadd.f32 %v710_v4, %v677_v44  ;;  %v717_v56 = vadd.f32 %v708_v7, %v676_v45 }
 0x6f3   :  { %v751_v11 = vpop.permute.xlu0 %750  ;;  %v758_v63 = vadd.f32 %v749_v13, %v717_v56  ;;  %v877_v13 = vmul.f32 %v2435_v46, %v2367_v34 }
 0x6f4   :  { %v827_v29 = vpop.permute.xlu1 %826  ;;  %v759_v62 = vadd.f32 %v751_v11, %v718_v55  ;;  %v878_v11 = vmul.f32 %v2435_v46, %v2364_v32 }
 0x6f5   :  { %945 = vrot.lane.b32.xlu0 %v934_v41, %s2202_s8  ;;  %943 = vrot.lane.b32.xlu1 %v933_v43, %s2202_s8  ;;  %v838_v39 = vadd.f32 %v827_v29, %v797_v42  ;;  %v799_v30 = vadd.f32 %v790_v21, %v758_v63 }
 0x6f7   :  { %v788_v15 = vpop.permute.xlu0 %787  ;;  %v879_v43 = vadd.f32 %v875_v51, %v838_v39  ;;  %v2203_v51 = vmov 0  }
 0x6f8   :  { %v831_v38 = vpop.permute.xlu1 %830  ;;  %v798_v40 = vadd.f32 %v788_v15, %v757_v31  ;;  %2089 = vset.pattern.permute.xlu0 %v2203_v51  ;;  %2088 = vset.pattern.permute.xlu1 %v2203_v51 }
 0x6f9   :  { %969 = vrot.lane.b32.xlu0 %v958_v50, %s2191_s2  ;;  %967 = vrot.lane.b32.xlu1 %v957_v59, %s2191_s2  ;;  %v840_v17 = vadd.f32 %v831_v38, %v799_v30 }
 0x6fb   :  { %v792_v19 = vpop.permute.xlu0 %791  ;;  %v881_v26 = vadd.f32 %v877_v13, %v840_v17 }
 0x6fc   :  { %v800_v10 = vadd.f32 %v792_v19, %v759_v62 }
 0x6fd   :  { %1006 = vbcast.lane.b32.xlu0 %v1004_v60, 256  ;;  %1010 = vbcast.lane.b32.xlu1 %v1004_v60, 264 }
 0x6ff   :  { %v829_v27 = vpop.permute.xlu0 %828 }
 0x700   :  { %v839_v37 = vadd.f32 %v829_v27, %v798_v40  ;;  %v983_v40 = vld [vmem:[#allocation4 + $0x14d] ss:$0 sm:$0xff] }
 0x702   :  { %v880_v41 = vadd.f32 %v876_v48, %v839_v37 }
 0x703   :  { %v833_v35 = vpop.permute.xlu0 %832 }
 0x704   :  { %v841_v16 = vadd.f32 %v833_v35, %v800_v10 }
 0x706   :  { %v882_v25 = vadd.f32 %v878_v11, %v841_v16 }
 0x74f   :  { %v894_v47 = vpop.permute.xlu0 %893  ;;  %v892_v49 = vpop.permute.xlu1 %891 }
 0x750   :  { %v904_v57 = vadd.f32 %v894_v47, %v880_v41  ;;  %v903_v50 = vadd.f32 %v892_v49, %v879_v43  ;;  %v1015_v43 = vrot.slane %v2461_v52, %v2345_v14  ;;  %v2482_v52 = vand.u32 127, %v223_v18 }
 0x752   :  { %v1053_v10 = vadd.s32 4294967288, %v2482_v52 }
 0x753   :  { %v918_v8 = vpop.permute.xlu0 %917  ;;  %v916_v53 = vpop.permute.xlu1 %915 }
 0x754   :  { %v928_v5 = vadd.f32 %v918_v8, %v904_v57  ;;  %v927_v3 = vadd.f32 %v916_v53, %v903_v50 }
 0x757   :  { %v942_v59 = vpop.permute.xlu0 %941  ;;  %v940_v60 = vpop.permute.xlu1 %939 }
 0x758   :  { %v952_v6 = vadd.f32 %v942_v59, %v928_v5  ;;  %v951_v1 = vadd.f32 %v940_v60, %v927_v3 }
 0x75b   :  { %v966_v28 = vpop.permute.xlu0 %965  ;;  %v964_v9 = vpop.permute.xlu1 %963 }
 0x75c   :  { %v976_v36 = vadd.f32 %v966_v28, %v952_v6  ;;  %v975_v15 = vadd.f32 %v964_v9, %v951_v1 }
 0x75e   :  { %2102 = vtanh.f32 %v976_v36  ;;  %v2487_v36 = vsub.s32 %v2482_v52, %v2270_v20 }
 0x75f   :  { %2104 = vtanh.f32 %v975_v15  ;;  %v898_v4 = vpop.permute.xlu0 %897  ;;  %v896_v7 = vpop.permute.xlu1 %895  ;;  %v2490_v15 = vsub.s32 %v1053_v10, %v2270_v20  ;;  %v1786_v10 = vadd.s32 4294967184, %v2482_v52 }
 0x760   :  { %v906_v19 = vadd.f32 %v898_v4, %v882_v25  ;;  %v905_v21 = vadd.f32 %v896_v7, %v881_v26 }
 0x763   :  { %v922_v23 = vpop.permute.xlu0 %921  ;;  %v920_v24 = vpop.permute.xlu1 %919 }
 0x764   :  { %v930_v31 = vadd.f32 %v922_v23, %v906_v19  ;;  %v929_v33 = vadd.f32 %v920_v24, %v905_v21 }
 0x767   :  { %v946_v27 = vpop.permute.xlu0 %945  ;;  %v944_v29 = vpop.permute.xlu1 %943 }
 0x768   :  { %v954_v42 = vadd.f32 %v946_v27, %v930_v31  ;;  %v953_v35 = vadd.f32 %v944_v29, %v929_v33 }
 0x76b   :  { %v2103_v38 = vpop.eup %2102  ;;  %v970_v44 = vpop.permute.xlu0 %969 }
 0x76c   :  { %v968_v45 = vpop.permute.xlu1 %967  ;;  %v2105_v32 = vpop.eup %2104  ;;  %v978_v47 = vadd.f32 %v970_v44, %v954_v42  ;;  %v985_v34 = vmul.f32 %v2103_v38, %v983_v40 }
 0x76d   :  { %v977_v49 = vadd.f32 %v968_v45, %v953_v35  ;;  %v984_v46 = vmul.f32 %v2105_v32, %v983_v40 }
 0x76e   :  { %2106 = vtanh.f32 %v978_v47  ;;  %v991_v37 = vsel %vm357_vm5, %v985_v34, 0.0 }
 0x76f   :  { %2108 = vtanh.f32 %v977_v49  ;;  %992 = vadd.xlane.f32.xlu0 %v991_v37  ;;  %v988_v39 = vsel %vm357_vm5, %v984_v46, 0.0  ;;  %v1007_v57 = vpop.permute.xlu0 %1006 }
 0x770   :  { %989 = vadd.xlane.f32.xlu1 %v988_v39  ;;  %v1011_v50 = vpop.permute.xlu1 %1010 }
 0x77b   :  { %v2107_v48 = vpop.eup %2106 }
 0x77c   :  { %v2109_v8 = vpop.eup %2108  ;;  %v987_v53 = vmul.f32 %v2107_v48, %v983_v40 }
 0x77d   :  { %v986_v55 = vmul.f32 %v2109_v8, %v983_v40 }
 0x77e   :  { %v997_v56 = vsel %vm357_vm5, %v987_v53, 0.0 }
 0x77f   :  { %998 = vadd.xlane.f32.xlu1 %v997_v56  ;;  %v994_v41 = vsel %vm357_vm5, %v986_v55, 0.0 }
 0x780   :  { %995 = vadd.xlane.f32.xlu0 %v994_v41 }
 0x790   :  { %1017 = vbcast.lane.b32.xlu1 %v1015_v43, 256 }
 0x796   :  { %1021 = vbcast.lane.b32.xlu0 %v1015_v43, 264 }
 0x7f8   :  { %v993_v59 = vpop.xlane.xlu0 %992 }
 0x7f9   :  { %v1028_v60 = vadd.f32 %v1011_v50, %v993_v59  ;;  %v990_v62 = vpop.xlane.xlu1 %989 }
 0x7fa   :  { %v1027_v63 = vadd.f32 %v1007_v57, %v990_v62 }
 0x7fb   :  { %1039 = vperm.xlu0 %2089, %v1028_v60  }
 0x7fc   :  { %1036 = vperm.xlu1 %2088, %v1027_v63  }
 0x808   :  { %v999_v5 = vpop.xlane.xlu1 %998 }
 0x809   :  { %v996_v3 = vpop.xlane.xlu0 %995 }
 0x80c   :  { %v1018_v6 = vpop.permute.xlu1 %1017 }
 0x80d   :  { %v1029_v1 = vadd.f32 %v1018_v6, %v996_v3  ;;  %v1022_v28 = vpop.permute.xlu0 %1021  ;;  %v1247_v6 = vld [vmem:[#allocation2 + $0x10] sm:$0xff] }
 0x80e   :  { %v1030_v9 = vadd.f32 %v1022_v28, %v999_v5  ;;  %v1248_v5 = vld [vmem:[#allocation2 + $0x18] sm:$0xff] }
 0x80f   :  { %1042 = vperm.xlu1 %2088, %v1029_v1   ;;  %1991 = vmatpush3.msra.mxu1 %v1248_v5 }
 0x810   :  { %1992 = vmatprep.subr.mxu1 %v2188_v0 }
 0x811   :  { %1993 = vmatpush3.msra.mxu1 %v1247_v6 }
 0x812   :  { %2016 = vmatprep.subr.mxu1 %v2188_v0 }
 0x813   :  { %1045 = vperm.xlu1 %2088, %v1030_v9  }
 0x876   :  { %v1040_v4 = vpop.permute.xlu0 %1039 }
 0x877   :  { %v1037_v30 = vpop.permute.xlu1 %1036  ;;  %v1057_v17 = vrot.slane %v1040_v4, %v2490_v15 }
 0x878   :  { %v1052_v16 = vrot.slane %v1037_v30, %v2487_v36 }
 0x87a   :  { %v1059_v23 = vsel %vm1058_vm8, %v1057_v17, %v1052_v16 }
 0x88a   :  { %v1043_v7 = vpop.permute.xlu1 %1042 }
 0x88b   :  { %v1063_v18 = vrot.slane %v1043_v7, %v2487_v36 }
 0x88e   :  { %v1046_v11 = vpop.permute.xlu1 %1045 }
 0x88f   :  { %v1067_v13 = vrot.slane %v1046_v11, %v2490_v15  ;;  %v1789_v11 = vsub.s32 %v1786_v10, %v2270_v20 }
 0x891   :  { %v1068_v24 = vsel %vm1058_vm8, %v1067_v13, %v1063_v18 }
 0x892   :  { %v1070_v25 = vsel %vm1069_vm9, %v1068_v24, %v1059_v23 }
 0x893   :  { %v1073_v26 = vsel %vm1072_vm10, %v1070_v25, -inf }
 0x894   :  { %1074 = vmax.xlane.f32.xlu0 %v1073_v26 }
 0x91d   :  { %v1075_v19 = vpop.xlane.xlu0 %1074 }
 0x91e   :  { %v1080_v21 = vrot.slane %v1075_v19, %v2342_v12  ;;  %v1084_v27 = vrot.slane %v1075_v19, %v2345_v14 }
 0x920   :  { %v1087_v29 = vsub.f32 %v1027_v63, %v1080_v21  ;;  %v1088_v31 = vsub.f32 %v1028_v60, %v1080_v21  ;;  %v1089_v40 = vsub.f32 %v1029_v1, %v1084_v27  ;;  %v1090_v35 = vsub.f32 %v1030_v9, %v1084_v27  ;;  %v1156_v1 = vld [vmem:[#allocation2 + $0x8] sm:$0xff]  ;;  %v1354_v27 = vld [vmem:[#allocation4 + $0x130] sm:$0xff] }
 0x921   :  { %1984 = vmatpush3.msra.mxu0 %v1156_v1  ;;  %v1791_v9 = vadd.s32 4294967176, %v2482_v52 }
 0x922   :  { %v1091_v33 = vmul.f32 1.442695, %v1087_v29  ;;  %v1093_v42 = vmul.f32 1.442695, %v1088_v31  ;;  %v1095_v38 = vmul.f32 1.442695, %v1089_v40  ;;  %1985 = vmatprep.subr.mxu0 %v2188_v0 }
 0x923   :  { %v1097_v44 = vmul.f32 1.442695, %v1090_v35  ;;  %v1794_v17 = vsub.s32 %v1791_v9, %v2270_v20  ;;  %v2543_v35 = vld [vmem:[#allocation4 + $0x68] sm:$0xff] }
 0x924   :  { %2110 = vpow2.f32 %v1091_v33  ;;  %v1353_v33 = vld [vmem:[#allocation4 + $0x108] sm:$0xff] }
 0x925   :  { %2112 = vpow2.f32 %v1093_v42  ;;  %v2540_v42 = vld [vmem:[#allocation4 + $0x90] sm:$0xff] }
 0x926   :  { %2114 = vpow2.f32 %v1095_v38  ;;  %v2549_v38 = vld [vmem:[#allocation4 + $0x40] sm:$0xff] }
 0x927   :  { %2116 = vpow2.f32 %v1097_v44  ;;  %v2551_v44 = vld [vmem:[#allocation4 + $0x18] sm:$0xff] }
 0x931   :  { %v2111_v45 = vpop.eup %2110 }
 0x932   :  { %1104 = vperm.xlu1 %2088, %v2111_v45   ;;  %v2113_v32 = vpop.eup %2112 }
 0x933   :  { %v2115_v47 = vpop.eup %2114 }
 0x934   :  { %v2117_v49 = vpop.eup %2116 }
 0x936   :  { %1107 = vperm.xlu1 %2088, %v2113_v32  }
 0x93a   :  { %1110 = vperm.xlu1 %2088, %v2115_v47  }
 0x93e   :  { %1113 = vperm.xlu1 %2088, %v2117_v49  }
 0x9ad   :  { %v1105_v34 = vpop.permute.xlu1 %1104 }
 0x9ae   :  { %v1118_v51 = vrot.slane %v1105_v34, %v2487_v36  ;;  %v1441_v34 = vld [vmem:[#allocation4 + $0x80] sm:$0xff] }
 0x9b1   :  { %v1108_v46 = vpop.permute.xlu1 %1107 }
 0x9b2   :  { %v1122_v39 = vrot.slane %v1108_v46, %v2490_v15 }
 0x9b4   :  { %v1123_v55 = vsel %vm1058_vm8, %v1122_v39, %v1118_v51 }
 0x9b5   :  { %v1111_v37 = vpop.permute.xlu1 %1110 }
 0x9b6   :  { %v1127_v8 = vrot.slane %v1111_v37, %v2487_v36 }
 0x9b9   :  { %v1114_v48 = vpop.permute.xlu1 %1113 }
 0x9ba   :  { %v1131_v53 = vrot.slane %v1114_v48, %v2490_v15 }
 0x9bc   :  { %v1132_v56 = vsel %vm1058_vm8, %v1131_v53, %v1127_v8 }
 0x9bd   :  { %v1133_v41 = vsel %vm1069_vm9, %v1132_v56, %v1123_v55  ;;  %v1439_v56 = vld [vmem:[#allocation4 + $0x30] sm:$0xff] }
 0x9be   :  { %v1135_v43 = vsel %vm1072_vm10, %v1133_v41, 0.0  ;;  %v1438_v41 = vld [vmem:[#allocation4 + $0x8] sm:$0xff] }
 0x9bf   :  { %1136 = vadd.xlane.f32.xlu1 %v1135_v43 }
 0xa48   :  { %v1137_v57 = vpop.xlane.xlu1 %1136 }
 0xa49   :  { %v1146_v50 = vrot.slane %v1137_v57, %v2345_v14  ;;  %v1142_v59 = vrot.slane %v1137_v57, %v2342_v12  ;;  %v1155_v14 = vld [vmem:[#allocation2] sm:$0xff]  ;;  %v1355_v57 = vld [vmem:[#allocation4 + $0x14e] ss:$0 sm:$0xff] }
 0xa4a   :  { %1986 = vmatpush3.msra.mxu0 %v1155_v14 }
 0xa4b   :  { %2118 = vrcp.f32 %v1146_v50  ;;  %1997 = vmatprep.subr.mxu0 %v2188_v0 }
 0xa4c   :  { %2120 = vrcp.f32 %v1142_v59 }
 0xa58   :  { %v2119_v60 = vpop.eup %2118 }
 0xa59   :  { %v1154_v62 = vmul.f32 %v2119_v60, %v2117_v49  ;;  %v1153_v63 = vmul.f32 %v2119_v60, %v2115_v47  ;;  %v2121_v3 = vpop.eup %2120  ;;  %v1443_v47 = vld [vmem:[#allocation4 + $0xd0] sm:$0xff]  ;;  %v1442_v49 = vld [vmem:[#allocation4 + $0xa8] sm:$0xff] }
 0xa5a   :  { %v1150_v28 = vmul.f32 %v2121_v3, %v2111_v45  ;;  %v1151_v12 = vmul.f32 %v2121_v3, %v2113_v32  ;;  %v1445_v45 = vld [vmem:[#allocation4 + $0x120] sm:$0xff]  ;;  %v1444_v32 = vld [vmem:[#allocation4 + $0xf8] sm:$0xff]  ;;  %v1446_v3 = vld [vmem:[#allocation4 + $0x14f] ss:$0 sm:$0xff] }
 0xa5b   :  { %1255 = vperm.xlu1 %2088, %v1154_v62   ;;  %1252 = vperm.xlu0 %2089, %v1153_v63  }
 0xa5f   :  { %1160 = vperm.xlu0 %2089, %v1150_v28  }
 0xa63   :  { %1163 = vperm.xlu0 %2089, %v1151_v12  }
 0xa67   :  { %1343 = vrot.lane.b32.xlu0 %v2329_v2, %s2191_s2 }
 0xa6b   :  { %1430 = vrot.lane.b32.xlu0 %v2273_v22, %s2204_s9  ;;  %v1440_v22 = vld [vmem:[#allocation4 + $0x58] sm:$0xff] }
 0xa6f   :  { %1432 = vrot.lane.b32.xlu0 %v2301_v54, %s2204_s9 }
 0xad6   :  { %v1256_v30 = vpop.permute.xlu1 %1255  ;;  %v1253_v4 = vpop.permute.xlu0 %1252 }
 0xad7   :  { %v1264_v7 = vrot.slane %v1256_v30, %v2490_v15  ;;  %v1260_v16 = vrot.slane %v1253_v4, %v2487_v36  ;;  %v1805_v23 = vrot.slane %v1256_v30, %v1794_v17  ;;  %v1801_v52 = vrot.slane %v1253_v4, %v1789_v11 }
 0xad9   :  { %v1265_v18 = vsel %vm1058_vm8, %v1264_v7, %v1260_v16  ;;  %v1806_v20 = vsel %vm1796_vm11, %v1805_v23, %v1801_v52  ;;  %v1559_v23 = vld [vmem:[#allocation4 + $0xd8] sm:$0xff]  ;;  %v1558_v52 = vld [vmem:[#allocation4 + $0xb0] sm:$0xff] }
 0xada   :  { %1995 = vmatmul.mubr.msk.f32.vlgmr.msra.gmra.mxu1 %vm357_vm5, %v1265_v18  ;;  %v1161_v13 = vpop.permute.xlu0 %1160  ;;  %v1561_v18 = vld [vmem:[#allocation4 + $0x128] sm:$0xff] }
 0xadb   :  { %2032 = vmatprep.mubr.msk.f32.mxu1 %vm2189_vm0, %v2188_v0  ;;  %v1168_v25 = vrot.slane %v1161_v13, %v2487_v36  ;;  %v1790_v26 = vrot.slane %v1161_v13, %v1789_v11  ;;  %v1352_v36 = vld [vmem:[#allocation4 + $0xe0] sm:$0xff]  ;;  %2017 = vmatpush3.msra.mxu1 %v1445_v45 }
 0xadc   :  { %2018 = vmatprep.subr.mxu1 %v2188_v0  ;;  %v1560_v13 = vld [vmem:[#allocation4 + $0x100] sm:$0xff] }
 0xadd   :  { %2019 = vmatpush3.msra.mxu1 %v1444_v32 }
 0xade   :  { %v1164_v24 = vpop.permute.xlu0 %1163  ;;  %2020 = vmatprep.subr.mxu1 %v2188_v0 }
 0xadf   :  { %v1172_v19 = vrot.slane %v1164_v24, %v2490_v15  ;;  %v1795_v21 = vrot.slane %v1164_v24, %v1794_v17  ;;  %v1351_v15 = vld [vmem:[#allocation4 + $0xb8] sm:$0xff]  ;;  %2021 = vmatpush3.msra.mxu1 %v1443_v47  ;;  %v1557_v24 = vld [vmem:[#allocation4 + $0x88] sm:$0xff] }
 0xae0   :  { %2022 = vmatprep.subr.mxu1 %v2188_v0 }
 0xae1   :  { %v1797_v29 = vsel %vm1796_vm11, %v1795_v21, %v1790_v26  ;;  %v1173_v31 = vsel %vm1058_vm8, %v1172_v19, %v1168_v25  ;;  %2023 = vmatpush3.msra.mxu1 %v1442_v49  ;;  %v1555_v26 = vld [vmem:[#allocation4 + $0x38] sm:$0xff]  ;;  %v1554_v19 = vld [vmem:[#allocation4 + $0x10] sm:$0xff] }
 0xae2   :  { %1988 = vmatmul.mubr.msk.f32.vlgmr.msra.gmra.mxu0 %vm357_vm5, %v1173_v31  ;;  %v2533_v40 = vsel %vm1069_vm9, %v1806_v20, %v1797_v29  ;;  %2024 = vmatprep.subr.mxu1 %v2188_v0  ;;  %v1344_v51 = vpop.permute.xlu0 %1343 }
 0xae3   :  { %1998 = vmatpush3.msra.mxu0 %v1354_v27  ;;  %2013 = vmatprep.mubr.msk.f32.mxu0 %vm2189_vm0, %v2188_v0 }
 0xae4   :  { %1999 = vmatprep.subr.mxu0 %v2188_v0  ;;  %2025 = vmatpush3.msra.mxu1 %v1441_v34 }
 0xae5   :  { %2000 = vmatpush3.msra.mxu0 %v1353_v33  ;;  %2026 = vmatprep.subr.mxu1 %v2188_v0 }
 0xae6   :  { %2001 = vmatprep.subr.mxu0 %v2188_v0  ;;  %2027 = vmatpush3.msra.mxu1 %v1440_v22  ;;  %v1431_v43 = vpop.permute.xlu0 %1430 }
 0xae7   :  { %2002 = vmatpush3.msra.mxu0 %v1352_v36  ;;  %2028 = vmatprep.subr.mxu1 %v2188_v0  ;;  %v1562_v36 = vld [vmem:[#allocation4 + $0x170] ss:$0 sm:$0xff] }
 0xae8   :  { %2003 = vmatprep.subr.mxu0 %v2188_v0  ;;  %2029 = vmatpush3.msra.mxu1 %v1439_v56 }
 0xae9   :  { %2004 = vmatpush3.msra.mxu0 %v1351_v15  ;;  %2030 = vmatprep.subr.mxu1 %v2188_v0 }
 0xaea   :  { %2005 = vmatprep.subr.mxu0 %v2188_v0  ;;  %2031 = vmatpush3.msra.mxu1 %v1438_v41  ;;  %v1433_v50 = vpop.permute.xlu0 %1432 }
 0xaeb   :  { %2006 = vmatpush3.msra.mxu0 %v2540_v42  ;;  %2054 = vmatprep.subr.mxu1 %v2188_v0  ;;  %v1435_v62 = vsel %vm1434_vm14, %v1431_v43, %v1433_v50 }
 0xaec   :  { %2007 = vmatprep.subr.mxu0 %v2188_v0 }
 0xaed   :  { %2008 = vmatpush3.msra.mxu0 %v2543_v35 }
 0xaee   :  { %2009 = vmatprep.subr.mxu0 %v2188_v0 }
 0xaef   :  { %2010 = vmatpush3.msra.mxu0 %v2549_v38 }
 0xaf0   :  { %2011 = vmatprep.subr.mxu0 %v2188_v0 }
 0xaf1   :  { %2012 = vmatpush3.msra.mxu0 %v2551_v44 }
 0xaf2   :  { %2035 = vmatprep.subr.mxu0 %v2188_v0 }
 0xb9a   :  { %v1334_v46 = vpop.f32.mrf.mxu1 }
 0xb9b   :  { %v1339_v39 = vrot.slane %v1334_v46, 7 }
 0xb9c   :  { %v1996_v37 = vpop.f32.mrf.mxu1 }
 0xba2   :  { %v1242_v48 = vpop.f32.mrf.mxu0 }
 0xba3   :  { %v2565_v8 = vsel %vm1341_vm12, %v1242_v48, %v1339_v39 }
 0xba4   :  { %v1346_v53 = vsel %vm145_vm2, %v2565_v8, %v1344_v51  ;;  %v1989_v55 = vpop.f32.mrf.mxu0 }
 0xba5   :  { %2014 = vmatmul.mubr.msk.f32.vlgmr.msra.gmra.mxu0 %vm1356_vm13, %v1346_v53 }
 0xba6   :  { %2051 = vmatprep.mubr.msk.f32.mxu0 %vm2189_vm0, %v2188_v0  ;;  %2036 = vmatpush3.msra.mxu0 %v1561_v18 }
 0xba7   :  { %2037 = vmatprep.subr.mxu0 %v2188_v0 }
 0xba8   :  { %2038 = vmatpush3.msra.mxu0 %v1560_v13 }
 0xba9   :  { %2039 = vmatprep.subr.mxu0 %v2188_v0 }
 0xbaa   :  { %2040 = vmatpush3.msra.mxu0 %v1559_v23 }
 0xbab   :  { %2041 = vmatprep.subr.mxu0 %v2188_v0 }
 0xbac   :  { %2042 = vmatpush3.msra.mxu0 %v1558_v52 }
 0xbad   :  { %2043 = vmatprep.subr.mxu0 %v2188_v0 }
 0xbae   :  { %2044 = vmatpush3.msra.mxu0 %v1557_v24 }
 0xbaf   :  { %2045 = vmatprep.subr.mxu0 %v2188_v0 }
 0xc65   :  { %v1426_v59 = vpop.f32.mrf.mxu0 }
 0xc66   :  { %v1427_v60 = vadd.f32 %v1426_v59, %v1355_v57 }
 0xc67   :  { %v2015_v63 = vpop.f32.mrf.mxu0 }
 0xc68   :  { %v1437_v5 = vsel %vm145_vm2, %v1427_v60, %v1435_v62 }
 0xc69   :  { %2033 = vmatmul.mubr.msk.f32.vlgmr.msra.gmra.mxu1 %vm1356_vm13, %v1437_v5 }
 0xc6a   :  { %2062 = vmatprep.mubr.msk.f32.mxu1 %vm2189_vm0, %v2188_v0 }
 0xd29   :  { %v1516_v6 = vpop.f32.mrf.mxu1 }
 0xd2a   :  { %v1517_v1 = vadd.f32 %v1516_v6, %v1446_v3 }
 0xd2b   :  { %v2034_v28 = vpop.f32.mrf.mxu1 }
 0xd2c   :  { %2122 = vtanh.f32 %v1517_v1  ;;  %v1847_v14 = vmul.f32 -1.442695, %v1517_v1 }
 0xd2e   :  { %2124 = vpow2.f32 %v1847_v14 }
 0xd39   :  { %v2123_v12 = vpop.eup %2122 }
 0xd3a   :  { %1530 = vrot.lane.b32.xlu1 %v2123_v12, %s2191_s2 }
 0xd3b   :  { %v2125_v9 = vpop.eup %2124 }
 0xd3c   :  { %v1523_v10 = vadd.f32 1.0, %v2125_v9 }
 0xd3e   :  { %2126 = vrcp.f32 %v1523_v10 }
 0xd4b   :  { %v2127_v30 = vpop.eup %2126 }
 0xd4c   :  { %v1528_v16 = vmul.f32 %v2127_v30, %v2311_v61  ;;  %v1556_v61 = vld [vmem:[#allocation4 + $0x60] sm:$0xff] }
 0xd4d   :  { %2046 = vmatpush3.msra.mxu0 %v1556_v61 }
 0xd4e   :  { %2047 = vmatprep.subr.mxu0 %v2188_v0 }
 0xd4f   :  { %2048 = vmatpush3.msra.mxu0 %v1555_v26 }
 0xd50   :  { %2049 = vmatprep.subr.mxu0 %v2188_v0 }
 0xd51   :  { %2050 = vmatpush3.msra.mxu0 %v1554_v19 }
 0xdac   :  { %v1531_v4 = vpop.permute.xlu1 %1530 }
 0xdad   :  { %v1533_v7 = vmul.f32 %v2127_v30, %v1531_v4 }
 0xdaf   :  { %1535 = vrot.lane.b32.xlu0 %v1533_v7, %s2195_s29 }
 0xe21   :  { %v1536_v17 = vpop.permute.xlu0 %1535 }
 0xe22   :  { %v2581_v11 = vadd.f32 %v1536_v17, %v1528_v16 }
 0xe24   :  { %2128 = vtanh.f32 %v2581_v11 }
 0xe31   :  { %v2129_v25 = vpop.eup %2128 }
 0xe32   :  { %1541 = vrot.lane.b32.xlu1 %v2129_v25, %s2191_s2 }
 0xe36   :  { %1550 = vrot.lane.b32.xlu1 %v2301_v54, %s2193_s0 }
 0xe3a   :  { %1643 = vrot.lane.b32.xlu1 %v2301_v54, %s2194_s28 }
 0xea4   :  { %v1542_v21 = vpop.permute.xlu1 %1541 }
 0xea5   :  { %v1544_v27 = vmul.f32 %v2127_v30, %v1542_v21 }
 0xea7   :  { %1546 = vrot.lane.b32.xlu0 %v1544_v27, %s2195_s29 }
 0xea8   :  { %v1551_v29 = vpop.permute.xlu1 %1550 }
 0xeac   :  { %v1644_v39 = vpop.permute.xlu1 %1643 }
 0xf19   :  { %v1547_v20 = vpop.permute.xlu0 %1546 }
 0xf1a   :  { %v1549_v31 = vadd.f32 %v1547_v20, %v1427_v60 }
 0xf1c   :  { %v1553_v33 = vsel %vm145_vm2, %v1549_v31, %v1551_v29 }
 0xf1d   :  { %2052 = vmatmul.mubr.msk.f32.vlgmr.msra.gmra.mxu0 %vm1356_vm13, %v1553_v33 }
 0xfdd   :  { %v1632_v15 = vpop.f32.mrf.mxu0 }
 0xfde   :  { %v1633_v54 = vadd.f32 %v1632_v15, %v1562_v36 }
 0xfdf   :  { %v2053_v45 = vpop.f32.mrf.mxu0 }
 0xfe0   :  { %2130 = vtanh.f32 %v1633_v54  ;;  %v1849_v47 = vmul.f32 -1.442695, %v1633_v54 }
 0xfe2   :  { %2132 = vpow2.f32 %v1849_v47 }
 0xfed   :  { %v2131_v32 = vpop.eup %2130 }
 0xfee   :  { %1648 = vrot.lane.b32.xlu0 %v2131_v32, %s2191_s2 }
 0xfef   :  { %v2133_v49 = vpop.eup %2132 }
 0xff0   :  { %v1639_v34 = vadd.f32 1.0, %v2133_v49 }
 0xff2   :  { %2134 = vrcp.f32 %v1639_v34 }
 0xfff   :  { %v2135_v22 = vpop.eup %2134 }
0x1000   :  { %v1646_v48 = vmul.f32 %v2135_v22, %v1644_v39 }
0x1060   :  { %v1649_v46 = vpop.permute.xlu0 %1648 }
0x1061   :  { %v1651_v37 = vmul.f32 %v2135_v22, %v1649_v46 }
0x1063   :  { %1653 = vrot.lane.b32.xlu0 %v1651_v37, %s2195_s29 }
0x1067   :  { %1682 = vrot.lane.b32.xlu0 %v2540_v42, %s2195_s29 }
0x106b   :  { %1678 = vrot.lane.b32.xlu0 %v2549_v38, %s2195_s29 }
0x106f   :  { %1676 = vrot.lane.b32.xlu0 %v2551_v44, %s2195_s29 }
0x1073   :  { %1772 = vrot.lane.b32.xlu0 %v1544_v27, %s2198_s5 }
0x1077   :  { %1765 = vrot.lane.b32.xlu0 %v2329_v2, %s2202_s8 }
0x107b   :  { %1769 = vrot.lane.b32.xlu0 %v2308_v58, %s2197_s4 }
0x10d5   :  { %v1654_v51 = vpop.permute.xlu0 %1653 }
0x10d6   :  { %v1656_v53 = vadd.f32 %v1654_v51, %v1646_v48 }
0x10d8   :  { %2136 = vtanh.f32 %v1656_v53 }
0x10d9   :  { %v1683_v42 = vpop.permute.xlu0 %1682 }
0x10da   :  { %2055 = vmatpush3.msra.mxu1 %v1683_v42 }
0x10db   :  { %2056 = vmatprep.subr.mxu1 %v2188_v0 }
0x10dd   :  { %v1679_v55 = vpop.permute.xlu0 %1678 }
0x10e1   :  { %v1677_v56 = vpop.permute.xlu0 %1676 }
0x10e5   :  { %v2137_v38 = vpop.eup %2136  ;;  %v1773_v50 = vpop.permute.xlu0 %1772 }
0x10e6   :  { %1659 = vrot.lane.b32.xlu1 %v2137_v38, %s2191_s2 }
0x10e9   :  { %v1766_v59 = vpop.permute.xlu0 %1765 }
0x10ea   :  { %1680 = vrot.lane.b32.xlu1 %v2543_v35, %s2195_s29 }
0x10ed   :  { %v1770_v6 = vpop.permute.xlu0 %1769 }
0x1158   :  { %v1660_v44 = vpop.permute.xlu1 %1659 }
0x1159   :  { %v1662_v2 = vmul.f32 %v2135_v22, %v1660_v44 }
0x115b   :  { %1664 = vrot.lane.b32.xlu1 %v1662_v2, %s2195_s29 }
0x115c   :  { %v1681_v58 = vpop.permute.xlu1 %1680 }
0x115d   :  { %2057 = vmatpush3.msra.mxu1 %v1681_v58 }
0x115e   :  { %2058 = vmatprep.subr.mxu1 %v2188_v0 }
0x115f   :  { %1762 = vrot.lane.b32.xlu1 %v2565_v8, %s2198_s5  ;;  %2059 = vmatpush3.msra.mxu1 %v1679_v55 }
0x1160   :  { %2060 = vmatprep.subr.mxu1 %v2188_v0 }
0x1161   :  { %2061 = vmatpush3.msra.mxu1 %v1677_v56 }
0x1163   :  { %1776 = vrot.lane.b32.xlu1 %v2581_v11, %s2200_s7 }
0x1167   :  { %1779 = vrot.lane.b32.xlu1 %v1662_v2, %s2202_s8 }
0x116b   :  { %1783 = vrot.lane.b32.xlu1 %v1656_v53, %s2197_s4 }
0x11cd   :  { %v1665_v35 = vpop.permute.xlu1 %1664 }
0x11ce   :  { %v1667_v41 = vadd.f32 %v1665_v35, %v1549_v31 }
0x11d0   :  { %2063 = vmatmul.mubr.msk.f32.vlgmr.msra.gmra.mxu1 %vm145_vm2, %v1667_v41 }
0x11d1   :  { %v1763_v43 = vpop.permute.xlu1 %1762 }
0x11d5   :  { %v1777_v57 = vpop.permute.xlu1 %1776 }
0x11d6   :  { %v1814_v0 = vsel %vm357_vm5, %v1773_v50, %v1777_v57 }
0x11d9   :  { %v1780_v8 = vpop.permute.xlu1 %1779 }
0x11da   :  { %v1815_v62 = vsel %vm238_vm3, %v1814_v0, %v1780_v8 }
0x11dd   :  { %v1784_v60 = vpop.permute.xlu1 %1783 }
0x11de   :  { %v1816_v5 = vsel %vm251_vm4, %v1815_v62, %v1784_v60 }
0x11df   :  { %v1817_v14 = vsel %vm1812_vm15, %v1816_v5, %v2533_v40 }
0x1290   :  { %v1757_v63 = vpop.f32.mrf.mxu1 }
0x1291   :  { %v1809_v3 = vsel %vm357_vm5, %v1757_v63, %v1763_v43 }
0x1292   :  { %v1810_v1 = vsel %vm238_vm3, %v1809_v3, %v1766_v59  ;;  %v2064_v28 = vpop.f32.mrf.mxu1 }
0x1293   :  { %v1811_v12 = vsel %vm251_vm4, %v1810_v1, %v1770_v6 }
0x1294   :  { %v1813_v9 = vsel %vm1812_vm15, %v1811_v12, %v1773_v50 }
0x1295   :  { %v1820_v10 = vcombine.low %v1813_v9, %v1817_v14 }
0x1297   :  { %1851 = vst.sshfl [vmem:[%s2639_s3] sm:$0x33 pattern:$0x76325410] %v1820_v10 }
0x1298   :  { %1834 = vsyncpa [#allocation3], 1 }
0x1299   :  { %1835 = vsyncpa [#allocation5], 1 }

</bundles_post_ra>
